<compile_context>
chip_gen: v7x
topology: tpu7x:2x2x1
jax: 0.10.0
libtpu: 0.0.40
codegen_flags: <defaults>
</compile_context>

<pallas_src>
import functools

import jax
import jax.numpy as jnp
from jax import lax
from jax.experimental import pallas as pl
from jax.experimental.pallas import tpu as pltpu

BETA = 0.3      # snn.Leaky beta
THRESH = 0.2    # snn.Leaky threshold
EPS = 1e-6      # matches the reference denominator epsilon


def head_kernel(x_ref, mu_ref, w_ref, gd_ref, out_ref,
                a_ref, b_ref, mem_ref, xprev_ref,
                r_s, ek_s, v_s, td_s, *, unroll):
    # x_ref:   (TT, TB, Dp) f32 time-major input chunk
    # mu_ref:  (1, Dp)      token-shift mix
    # w_ref:   (Dp, 4Dp)    fused [R | K | V | token_decay] weights (bf16/f32)
    # gd_ref:  (1, Dp)      global_decay parameter
    # out_ref: (TT, TB, Dp) f32 spikes (time-major)
    # a/b/mem/xprev_ref: (TB, Dp) f32 recurrent state (persists across grid)
    # r_s/ek_s/v_s/td_s:  (TT, TB, Dp) f32 per-chunk intermediates (scratch)
    TT, TB, Dp = x_ref.shape

    @pl.when(pl.program_id(1) == 0)          # new sequence along the T axis
    def _init():
        a_ref[...] = jnp.zeros_like(a_ref)
        b_ref[...] = jnp.zeros_like(b_ref)
        mem_ref[...] = jnp.zeros_like(mem_ref)
        xprev_ref[...] = jnp.zeros_like(xprev_ref)

    mu = mu_ref[...]                                        # (1, Dp)
    gexp = jnp.broadcast_to(jnp.exp(gd_ref[...]), (TB, Dp))  # exp(global_decay)

    # --- token shift over the chunk (previous token along time axis 0) ---
    x = x_ref[...]                                          # (TT, TB, Dp)
    if TT > 1:
        prev = jnp.concatenate([xprev_ref[...][None], x[:TT - 1]], axis=0)
    else:
        prev = xprev_ref[...][None]
    xs = mu * x + (1.0 - mu) * prev                         # (TT, TB, Dp)
    xprev_ref[...] = x[TT - 1]                              # carry to next chunk

    # --- one fused MXU matmul for all four projections of the chunk ---
    proj = jnp.dot(xs.reshape(TT * TB, Dp).astype(w_ref.dtype), w_ref[...],
                   preferred_element_type=jnp.float32)      # (TT*TB, 4Dp)
    proj = proj.reshape(TT, TB, 4 * Dp)

    # Hoisted non-linearities, written once to time-major VMEM scratch.
    r_s[...] = jax.nn.sigmoid(proj[:, :, 0 * Dp:1 * Dp])
    ek_s[...] = jnp.exp(jnp.minimum(proj[:, :, 1 * Dp:2 * Dp], 10.0))
    v_s[...] = proj[:, :, 2 * Dp:3 * Dp]
    # NOTE: unclamped exp, matching the PyTorch reference exactly.
    td_s[...] = jnp.exp(proj[:, :, 3 * Dp:4 * Dp])

    # --- serial recurrence + spiking neuron: leading-axis slices only ---
    def body(i, carry):
        a, b, mem = carry
        ek_t = ek_s[i]                                      # (TB, Dp)
        v_t = v_s[i]
        td_t = td_s[i]
        ge_t = gexp * ek_t                                  # recomputed per step
        a = ek_t * v_t + td_t * a
        b = ek_t + td_t * b
        tkv = (ge_t * v_t + a) / (ge_t + b + EPS)           # exact division
        tde = r_s[i] * tkv
        # snn.Leaky: reset-by-subtraction from previous membrane, '>' spike.
        reset = (mem > THRESH).astype(jnp.float32)
        mem = BETA * mem + tde - reset * THRESH
        out_ref[i] = (mem > THRESH).astype(jnp.float32)     # per-step store
        return a, b, mem

    a, b, mem = lax.fori_loop(0, TT, body,
                              (a_ref[...], b_ref[...], mem_ref[...]),
                              unroll=unroll)
    a_ref[...] = a
    b_ref[...] = b
    mem_ref[...] = mem


def head_forward(x, mu, wr, wk, wv, wtd, gd, *, tt_max=64, tb=None,
                 matmul_dtype=jnp.bfloat16):
    """x: (B, T, D) float32 -> spikes (B, T, D) float32.

    Weights are in `y = x @ W` layout (transpose of torch Linear's stored
    weight). `tb` optionally blocks the batch axis (parallel grid axis, useful
    on v7x's two TensorCores); it must divide B and be B or a multiple of 8.
    """
    B, T, D = x.shape
    x = x.astype(jnp.float32)

    Dp = max(128, ((D + 127) // 128) * 128)      # lane-dense feature dim
    tt_max = max(8, (tt_max // 8) * 8)           # chunk length multiple of 8
    if T <= tt_max:
        TT, T_pad = T, T                         # single full-extent chunk
    else:
        TT = tt_max
        T_pad = pl.cdiv(T, TT) * TT

    tb = B if tb is None else tb
    assert B % tb == 0 and (tb == B or tb % 8 == 0), "invalid batch block"

    # One wrapper transpose to time-major + zero padding of T and D.
    xt = jnp.transpose(x, (1, 0, 2))                         # (T, B, D)
    xt = jnp.pad(xt, ((0, T_pad - T), (0, 0), (0, Dp - D)))  # (T_pad, B, Dp)

    pad_w = lambda w: jnp.pad(w.astype(jnp.float32), ((0, Dp - D), (0, Dp - D)))
    w_fused = jnp.concatenate([pad_w(wr), pad_w(wk), pad_w(wv), pad_w(wtd)],
                              axis=1).astype(matmul_dtype)   # (Dp, 4Dp)
    mu_p = jnp.pad(mu.reshape(1, D).astype(jnp.float32), ((0, 0), (0, Dp - D)))
    gd_p = jnp.pad(gd.reshape(1, D).astype(jnp.float32), ((0, 0), (0, Dp - D)))

    if TT % 8 == 0:
        unroll = 8
    elif TT % 4 == 0:
        unroll = 4
    elif TT % 2 == 0:
        unroll = 2
    else:
        unroll = 1

    out = pl.pallas_call(
        functools.partial(head_kernel, unroll=unroll),
        out_shape=jax.ShapeDtypeStruct((T_pad, B, Dp), jnp.float32),
        grid_spec=pltpu.PrefetchScalarGridSpec(
            num_scalar_prefetch=0,
            grid=(B // tb, T_pad // TT),
            in_specs=[
                pl.BlockSpec((TT, tb, Dp), lambda b, t: (t, b, 0)),   # x chunk
                pl.BlockSpec((1, Dp), lambda b, t: (0, 0)),           # mu
                pl.BlockSpec((Dp, 4 * Dp), lambda b, t: (0, 0)),      # weights
                pl.BlockSpec((1, Dp), lambda b, t: (0, 0)),           # gd
            ],
            out_specs=pl.BlockSpec((TT, tb, Dp), lambda b, t: (t, b, 0)),
            scratch_shapes=[
                pltpu.VMEM((tb, Dp), jnp.float32),       # state_a
                pltpu.VMEM((tb, Dp), jnp.float32),       # state_b
                pltpu.VMEM((tb, Dp), jnp.float32),       # membrane
                pltpu.VMEM((tb, Dp), jnp.float32),       # x_{t-1} carry
                pltpu.VMEM((TT, tb, Dp), jnp.float32),   # r = sigmoid(R x)
                pltpu.VMEM((TT, tb, Dp), jnp.float32),   # exp(clamp(K x, 10))
                pltpu.VMEM((TT, tb, Dp), jnp.float32),   # V x
                pltpu.VMEM((TT, tb, Dp), jnp.float32),   # exp(token_decay x)
            ],
        ),
        compiler_params=pltpu.CompilerParams(
            dimension_semantics=("parallel", "arbitrary"),  # T axis is serial
            vmem_limit_bytes=32 * 1024 * 1024,              # safe on v5e/v6e/v7x
        ),
    )(xt, mu_p, w_fused, gd_p)

    out = out[:T, :, :D]                    # drop time / feature padding
    return jnp.transpose(out, (1, 0, 2))    # back to (B, T, D)


if __name__ == "__main__":
    B, T, D = 2, 8, 32
    key = jax.random.PRNGKey(0)
    ks = jax.random.split(key, 7)

    x = jax.random.normal(ks[0], (B, T, D), dtype=jnp.float32)

    # nn.Linear(D, D, bias=False) style init: U(-1/sqrt(D), 1/sqrt(D)).
    s = 1.0 / (D ** 0.5)
    wr = jax.random.uniform(ks[1], (D, D), jnp.float32, -s, s)
    wk = jax.random.uniform(ks[2], (D, D), jnp.float32, -s, s)
    wv = jax.random.uniform(ks[3], (D, D), jnp.float32, -s, s)
    wtd = jax.random.uniform(ks[4], (D, D), jnp.float32, -s, s)
    gd = jax.random.normal(ks[5], (1, D), dtype=jnp.float32)       # global_decay
    mu = jax.random.uniform(ks[6], (1, D), jnp.float32, 0.0, 1.0)  # token-shift mix

    out = head_forward(x, mu, wr, wk, wv, wtd, gd)
    out = jax.block_until_ready(out)

    assert out.shape == (B, T, D), out.shape
    assert out.dtype == jnp.float32
    # Spiking output must be binary.
    assert bool(jnp.all((out == 0.0) | (out == 1.0)))

    print("KERNEL_OK")
</pallas_src>

<mosaic_0001>
module attributes {stable_mosaic.version = 11 : i64} {
  func.func @head_kernel(%arg0: i32, %arg1: i32, %arg2: memref<8x2x128xf32, #tpu.memory_space<vmem>>, %arg3: memref<1x128xf32, #tpu.memory_space<vmem>>, %arg4: memref<128x512xbf16, #tpu.memory_space<vmem>>, %arg5: memref<1x128xf32, #tpu.memory_space<vmem>>, %arg6: memref<8x2x128xf32, #tpu.memory_space<vmem>>, %arg7: memref<2x128xf32, #tpu.memory_space<vmem>>, %arg8: memref<2x128xf32, #tpu.memory_space<vmem>>, %arg9: memref<2x128xf32, #tpu.memory_space<vmem>>, %arg10: memref<2x128xf32, #tpu.memory_space<vmem>>, %arg11: memref<8x2x128xf32, #tpu.memory_space<vmem>>, %arg12: memref<8x2x128xf32, #tpu.memory_space<vmem>>, %arg13: memref<8x2x128xf32, #tpu.memory_space<vmem>>, %arg14: memref<8x2x128xf32, #tpu.memory_space<vmem>>) attributes {dimension_semantics = [#tpu.dimension_semantics<parallel>, #tpu.dimension_semantics<arbitrary>], iteration_bounds = array<i64: 1, 1>, scalar_prefetch = 0 : i64, scratch_operands = 8 : i64, tpu.core_type = #tpu.core_type<tc>, window_params = [{transform_indices = @transform_0, window_bounds = array<i64: 8, 2, 128>}, {pipeline_mode = #tpu.pipeline_mode<synchronous>, transform_indices = @transform_1, window_bounds = array<i64: 1, 128>}, {pipeline_mode = #tpu.pipeline_mode<synchronous>, transform_indices = @transform_2, window_bounds = array<i64: 128, 512>}, {pipeline_mode = #tpu.pipeline_mode<synchronous>, transform_indices = @transform_3, window_bounds = array<i64: 1, 128>}, {transform_indices = @transform_4, window_bounds = array<i64: 8, 2, 128>}]} {
    %c0_i32 = arith.constant 0 : i32
    %0 = arith.cmpi eq, %arg1, %c0_i32 : i32
    %1 = arith.extui %0 : i1 to i32
    %c0_i32_0 = arith.constant 0 : i32
    %2 = arith.cmpi ne, %1, %c0_i32_0 : i32
    scf.if %2 {
      %cst_161 = arith.constant 0.000000e+00 : f32
      %397 = vector.broadcast %cst_161 : f32 to vector<2x128xf32>
      %c0_162 = arith.constant 0 : index
      %c0_163 = arith.constant 0 : index
      %398 = vector.load %arg7[%c0_162, %c0_163] : memref<2x128xf32, #tpu.memory_space<vmem>>, vector<2x128xf32>
      tpu.vector_store %arg7[%c0_162, %c0_163], %397 {strides = array<i32>} : memref<2x128xf32, #tpu.memory_space<vmem>>, vector<2x128xf32>,
      %cst_164 = arith.constant 0.000000e+00 : f32
      %399 = vector.broadcast %cst_164 : f32 to vector<2x128xf32>
      %c0_165 = arith.constant 0 : index
      %c0_166 = arith.constant 0 : index
      %400 = vector.load %arg8[%c0_165, %c0_166] : memref<2x128xf32, #tpu.memory_space<vmem>>, vector<2x128xf32>
      tpu.vector_store %arg8[%c0_165, %c0_166], %399 {strides = array<i32>} : memref<2x128xf32, #tpu.memory_space<vmem>>, vector<2x128xf32>,
      %cst_167 = arith.constant 0.000000e+00 : f32
      %401 = vector.broadcast %cst_167 : f32 to vector<2x128xf32>
      %c0_168 = arith.constant 0 : index
      %c0_169 = arith.constant 0 : index
      %402 = vector.load %arg9[%c0_168, %c0_169] : memref<2x128xf32, #tpu.memory_space<vmem>>, vector<2x128xf32>
      tpu.vector_store %arg9[%c0_168, %c0_169], %401 {strides = array<i32>} : memref<2x128xf32, #tpu.memory_space<vmem>>, vector<2x128xf32>,
      %cst_170 = arith.constant 0.000000e+00 : f32
      %403 = vector.broadcast %cst_170 : f32 to vector<2x128xf32>
      %c0_171 = arith.constant 0 : index
      %c0_172 = arith.constant 0 : index
      %404 = vector.load %arg10[%c0_171, %c0_172] : memref<2x128xf32, #tpu.memory_space<vmem>>, vector<2x128xf32>
      tpu.vector_store %arg10[%c0_171, %c0_172], %403 {strides = array<i32>} : memref<2x128xf32, #tpu.memory_space<vmem>>, vector<2x128xf32>,
    } else {
    }
    %c0 = arith.constant 0 : index
    %c0_1 = arith.constant 0 : index
    %3 = vector.load %arg3[%c0, %c0_1] : memref<1x128xf32, #tpu.memory_space<vmem>>, vector<1x128xf32>
    %c0_2 = arith.constant 0 : index
    %c0_3 = arith.constant 0 : index
    %4 = vector.load %arg5[%c0_2, %c0_3] : memref<1x128xf32, #tpu.memory_space<vmem>>, vector<1x128xf32>
    %5 = math.exp %4 : vector<1x128xf32>
    %6 = vector.shape_cast %5 : vector<1x128xf32> to vector<1x128xf32>
    %7 = vector.broadcast %6 : vector<1x128xf32> to vector<2x128xf32>
    %c0_4 = arith.constant 0 : index
    %c0_5 = arith.constant 0 : index
    %c0_6 = arith.constant 0 : index
    %8 = vector.load %arg2[%c0_4, %c0_5, %c0_6] : memref<8x2x128xf32, #tpu.memory_space<vmem>>, vector<8x2x128xf32>
    %c0_7 = arith.constant 0 : index
    %c0_8 = arith.constant 0 : index
    %9 = vector.load %arg10[%c0_7, %c0_8] : memref<2x128xf32, #tpu.memory_space<vmem>>, vector<2x128xf32>
    %10 = vector.shape_cast %9 : vector<2x128xf32> to vector<1x2x128xf32>
    %11 = vector.extract_strided_slice %8 {offsets = [0, 0, 0], sizes = [7, 2, 128], strides = [1, 1, 1]} : vector<8x2x128xf32> to vector<7x2x128xf32>
    %12 = tpu.concatenate %10, %11 in 0 : vector<1x2x128xf32>, vector<7x2x128xf32> -> vector<8x2x128xf32>
    %13 = vector.shape_cast %3 : vector<1x128xf32> to vector<1x1x128xf32>
    %14 = vector.broadcast %13 : vector<1x1x128xf32> to vector<8x2x128xf32>
    %15 = arith.mulf %14, %8 : vector<8x2x128xf32>
    %cst = arith.constant 1.000000e+00 : f32
    %16 = vector.broadcast %cst : f32 to vector<1x128xf32>
    %17 = arith.subf %16, %3 : vector<1x128xf32>
    %18 = vector.shape_cast %17 : vector<1x128xf32> to vector<1x1x128xf32>
    %19 = vector.broadcast %18 : vector<1x1x128xf32> to vector<8x2x128xf32>
    %20 = arith.mulf %19, %12 : vector<8x2x128xf32>
    %21 = arith.addf %15, %20 : vector<8x2x128xf32>
    %22 = vector.extract_strided_slice %8 {offsets = [7, 0, 0], sizes = [1, 2, 128], strides = [1, 1, 1]} : vector<8x2x128xf32> to vector<1x2x128xf32>
    %23 = vector.shape_cast %22 : vector<1x2x128xf32> to vector<2x128xf32>
    %c0_9 = arith.constant 0 : index
    %c0_10 = arith.constant 0 : index
    %24 = vector.load %arg10[%c0_9, %c0_10] : memref<2x128xf32, #tpu.memory_space<vmem>>, vector<2x128xf32>
    tpu.vector_store %arg10[%c0_9, %c0_10], %23 {strides = array<i32>} : memref<2x128xf32, #tpu.memory_space<vmem>>, vector<2x128xf32>,
    %25 = vector.shape_cast %21 : vector<8x2x128xf32> to vector<16x128xf32>
    %26 = arith.truncf %25 : vector<16x128xf32> to vector<16x128xbf16>
    %c0_11 = arith.constant 0 : index
    %c0_12 = arith.constant 0 : index
    %27 = vector.load %arg4[%c0_11, %c0_12] : memref<128x512xbf16, #tpu.memory_space<vmem>>, vector<128x512xbf16>
    %cst_13 = arith.constant dense<0.000000e+00> : vector<16x512xf32>
    %28 = tpu.matmul %26, %27, %cst_13 {dimension_numbers = #tpu.dot_dimension_numbers<[1], [0], [0], [1], [0, 0, 1, 1], [], []>} : vector<16x128xbf16>, vector<128x512xbf16>, vector<16x512xf32> -> vector<16x512xf32>
    %29 = vector.shape_cast %28 : vector<16x512xf32> to vector<8x2x512xf32>
    %30 = vector.extract_strided_slice %29 {offsets = [0, 0, 0], sizes = [8, 2, 128], strides = [1, 1, 1]} : vector<8x2x512xf32> to vector<8x2x128xf32>
    %31 = arith.negf %30 : vector<8x2x128xf32>
    %32 = math.exp %31 : vector<8x2x128xf32>
    %cst_14 = arith.constant 1.000000e+00 : f32
    %33 = vector.broadcast %cst_14 : f32 to vector<8x2x128xf32>
    %34 = arith.addf %33, %32 : vector<8x2x128xf32>
    %35 = arith.divf %33, %34 : vector<8x2x128xf32>
    %c0_15 = arith.constant 0 : index
    %c0_16 = arith.constant 0 : index
    %c0_17 = arith.constant 0 : index
    %36 = vector.load %arg11[%c0_15, %c0_16, %c0_17] : memref<8x2x128xf32, #tpu.memory_space<vmem>>, vector<8x2x128xf32>
    tpu.vector_store %arg11[%c0_15, %c0_16, %c0_17], %35 {strides = array<i32>} : memref<8x2x128xf32, #tpu.memory_space<vmem>>, vector<8x2x128xf32>,
    %37 = vector.extract_strided_slice %29 {offsets = [0, 0, 128], sizes = [8, 2, 128], strides = [1, 1, 1]} : vector<8x2x512xf32> to vector<8x2x128xf32>
    %cst_18 = arith.constant 1.000000e+01 : f32
    %38 = vector.broadcast %cst_18 : f32 to vector<8x2x128xf32>
    %39 = arith.minimumf %37, %38 : vector<8x2x128xf32>
    %40 = math.exp %39 : vector<8x2x128xf32>
    %c0_19 = arith.constant 0 : index
    %c0_20 = arith.constant 0 : index
    %c0_21 = arith.constant 0 : index
    %41 = vector.load %arg12[%c0_19, %c0_20, %c0_21] : memref<8x2x128xf32, #tpu.memory_space<vmem>>, vector<8x2x128xf32>
    tpu.vector_store %arg12[%c0_19, %c0_20, %c0_21], %40 {strides = array<i32>} : memref<8x2x128xf32, #tpu.memory_space<vmem>>, vector<8x2x128xf32>,
    %42 = vector.extract_strided_slice %29 {offsets = [0, 0, 256], sizes = [8, 2, 128], strides = [1, 1, 1]} : vector<8x2x512xf32> to vector<8x2x128xf32>
    %c0_22 = arith.constant 0 : index
    %c0_23 = arith.constant 0 : index
    %c0_24 = arith.constant 0 : index
    %43 = vector.load %arg13[%c0_22, %c0_23, %c0_24] : memref<8x2x128xf32, #tpu.memory_space<vmem>>, vector<8x2x128xf32>
    tpu.vector_store %arg13[%c0_22, %c0_23, %c0_24], %42 {strides = array<i32>} : memref<8x2x128xf32, #tpu.memory_space<vmem>>, vector<8x2x128xf32>,
    %44 = vector.extract_strided_slice %29 {offsets = [0, 0, 384], sizes = [8, 2, 128], strides = [1, 1, 1]} : vector<8x2x512xf32> to vector<8x2x128xf32>
    %45 = math.exp %44 : vector<8x2x128xf32>
    %c0_25 = arith.constant 0 : index
    %c0_26 = arith.constant 0 : index
    %c0_27 = arith.constant 0 : index
    %46 = vector.load %arg14[%c0_25, %c0_26, %c0_27] : memref<8x2x128xf32, #tpu.memory_space<vmem>>, vector<8x2x128xf32>
    tpu.vector_store %arg14[%c0_25, %c0_26, %c0_27], %45 {strides = array<i32>} : memref<8x2x128xf32, #tpu.memory_space<vmem>>, vector<8x2x128xf32>,
    %c0_28 = arith.constant 0 : index
    %c0_29 = arith.constant 0 : index
    %47 = vector.load %arg7[%c0_28, %c0_29] : memref<2x128xf32, #tpu.memory_space<vmem>>, vector<2x128xf32>
    %c0_30 = arith.constant 0 : index
    %c0_31 = arith.constant 0 : index
    %48 = vector.load %arg8[%c0_30, %c0_31] : memref<2x128xf32, #tpu.memory_space<vmem>>, vector<2x128xf32>
    %c0_32 = arith.constant 0 : index
    %c0_33 = arith.constant 0 : index
    %49 = vector.load %arg9[%c0_32, %c0_33] : memref<2x128xf32, #tpu.memory_space<vmem>>, vector<2x128xf32>
    %c0_i32_34 = arith.constant 0 : i32
    %50 = arith.index_cast %c0_i32_34 : i32 to index
    %c0_35 = arith.constant 0 : index
    %c0_36 = arith.constant 0 : index
    %51 = vector.load %arg12[%50, %c0_35, %c0_36] : memref<8x2x128xf32, #tpu.memory_space<vmem>>, vector<1x2x128xf32>
    %52 = vector.shape_cast %51 : vector<1x2x128xf32> to vector<2x128xf32>
    %53 = arith.index_cast %c0_i32_34 : i32 to index
    %c0_37 = arith.constant 0 : index
    %c0_38 = arith.constant 0 : index
    %54 = vector.load %arg13[%53, %c0_37, %c0_38] : memref<8x2x128xf32, #tpu.memory_space<vmem>>, vector<1x2x128xf32>
    %55 = vector.shape_cast %54 : vector<1x2x128xf32> to vector<2x128xf32>
    %56 = arith.index_cast %c0_i32_34 : i32 to index
    %c0_39 = arith.constant 0 : index
    %c0_40 = arith.constant 0 : index
    %57 = vector.load %arg14[%56, %c0_39, %c0_40] : memref<8x2x128xf32, #tpu.memory_space<vmem>>, vector<1x2x128xf32>
    %58 = vector.shape_cast %57 : vector<1x2x128xf32> to vector<2x128xf32>
    %59 = arith.mulf %7, %52 : vector<2x128xf32>
    %60 = arith.mulf %52, %55 : vector<2x128xf32>
    %61 = arith.mulf %58, %47 : vector<2x128xf32>
    %62 = arith.addf %60, %61 : vector<2x128xf32>
    %63 = arith.mulf %58, %48 : vector<2x128xf32>
    %64 = arith.addf %52, %63 : vector<2x128xf32>
    %65 = arith.mulf %59, %55 : vector<2x128xf32>
    %66 = arith.addf %65, %62 : vector<2x128xf32>
    %67 = arith.addf %59, %64 : vector<2x128xf32>
    %cst_41 = arith.constant 9.99999997E-7 : f32
    %68 = vector.broadcast %cst_41 : f32 to vector<2x128xf32>
    %69 = arith.addf %67, %68 : vector<2x128xf32>
    %70 = arith.divf %66, %69 : vector<2x128xf32>
    %71 = arith.index_cast %c0_i32_34 : i32 to index
    %c0_42 = arith.constant 0 : index
    %c0_43 = arith.constant 0 : index
    %72 = vector.load %arg11[%71, %c0_42, %c0_43] : memref<8x2x128xf32, #tpu.memory_space<vmem>>, vector<1x2x128xf32>
    %73 = vector.shape_cast %72 : vector<1x2x128xf32> to vector<2x128xf32>
    %74 = arith.mulf %73, %70 : vector<2x128xf32>
    %cst_44 = arith.constant 2.000000e-01 : f32
    %75 = vector.broadcast %cst_44 : f32 to vector<2x128xf32>
    %76 = arith.cmpf ogt, %49, %75 : vector<2x128xf32>
    %77 = arith.extui %76 : vector<2x128xi1> to vector<2x128xi32>
    %78 = arith.sitofp %77 : vector<2x128xi32> to vector<2x128xf32>
    %cst_45 = arith.constant 3.000000e-01 : f32
    %79 = vector.broadcast %cst_45 : f32 to vector<2x128xf32>
    %80 = arith.mulf %79, %49 : vector<2x128xf32>
    %81 = arith.addf %80, %74 : vector<2x128xf32>
    %cst_46 = arith.constant 2.000000e-01 : f32
    %82 = vector.broadcast %cst_46 : f32 to vector<2x128xf32>
    %83 = arith.mulf %78, %82 : vector<2x128xf32>
    %84 = arith.subf %81, %83 : vector<2x128xf32>
    %cst_47 = arith.constant 2.000000e-01 : f32
    %85 = vector.broadcast %cst_47 : f32 to vector<2x128xf32>
    %86 = arith.cmpf ogt, %84, %85 : vector<2x128xf32>
    %87 = arith.extui %86 : vector<2x128xi1> to vector<2x128xi32>
    %88 = arith.sitofp %87 : vector<2x128xi32> to vector<2x128xf32>
    %89 = arith.index_cast %c0_i32_34 : i32 to index
    %c0_48 = arith.constant 0 : index
    %c0_49 = arith.constant 0 : index
    %90 = vector.load %arg6[%89, %c0_48, %c0_49] : memref<8x2x128xf32, #tpu.memory_space<vmem>>, vector<1x2x128xf32>
    %91 = vector.shape_cast %90 : vector<1x2x128xf32> to vector<2x128xf32>
    %92 = vector.shape_cast %88 : vector<2x128xf32> to vector<1x2x128xf32>
    tpu.vector_store %arg6[%89, %c0_48, %c0_49], %92 {strides = array<i32>} : memref<8x2x128xf32, #tpu.memory_space<vmem>>, vector<1x2x128xf32>,
    %c1_i32 = arith.constant 1 : i32
    %93 = arith.index_cast %c1_i32 : i32 to index
    %c0_50 = arith.constant 0 : index
    %c0_51 = arith.constant 0 : index
    %94 = vector.load %arg12[%93, %c0_50, %c0_51] : memref<8x2x128xf32, #tpu.memory_space<vmem>>, vector<1x2x128xf32>
    %95 = vector.shape_cast %94 : vector<1x2x128xf32> to vector<2x128xf32>
    %96 = arith.index_cast %c1_i32 : i32 to index
    %c0_52 = arith.constant 0 : index
    %c0_53 = arith.constant 0 : index
    %97 = vector.load %arg13[%96, %c0_52, %c0_53] : memref<8x2x128xf32, #tpu.memory_space<vmem>>, vector<1x2x128xf32>
    %98 = vector.shape_cast %97 : vector<1x2x128xf32> to vector<2x128xf32>
    %99 = arith.index_cast %c1_i32 : i32 to index
    %c0_54 = arith.constant 0 : index
    %c0_55 = arith.constant 0 : index
    %100 = vector.load %arg14[%99, %c0_54, %c0_55] : memref<8x2x128xf32, #tpu.memory_space<vmem>>, vector<1x2x128xf32>
    %101 = vector.shape_cast %100 : vector<1x2x128xf32> to vector<2x128xf32>
    %102 = arith.mulf %7, %95 : vector<2x128xf32>
    %103 = arith.mulf %95, %98 : vector<2x128xf32>
    %104 = arith.mulf %101, %62 : vector<2x128xf32>
    %105 = arith.addf %103, %104 : vector<2x128xf32>
    %106 = arith.mulf %101, %64 : vector<2x128xf32>
    %107 = arith.addf %95, %106 : vector<2x128xf32>
    %108 = arith.mulf %102, %98 : vector<2x128xf32>
    %109 = arith.addf %108, %105 : vector<2x128xf32>
    %110 = arith.addf %102, %107 : vector<2x128xf32>
    %cst_56 = arith.constant 9.99999997E-7 : f32
    %111 = vector.broadcast %cst_56 : f32 to vector<2x128xf32>
    %112 = arith.addf %110, %111 : vector<2x128xf32>
    %113 = arith.divf %109, %112 : vector<2x128xf32>
    %114 = arith.index_cast %c1_i32 : i32 to index
    %c0_57 = arith.constant 0 : index
    %c0_58 = arith.constant 0 : index
    %115 = vector.load %arg11[%114, %c0_57, %c0_58] : memref<8x2x128xf32, #tpu.memory_space<vmem>>, vector<1x2x128xf32>
    %116 = vector.shape_cast %115 : vector<1x2x128xf32> to vector<2x128xf32>
    %117 = arith.mulf %116, %113 : vector<2x128xf32>
    %cst_59 = arith.constant 2.000000e-01 : f32
    %118 = vector.broadcast %cst_59 : f32 to vector<2x128xf32>
    %119 = arith.cmpf ogt, %84, %118 : vector<2x128xf32>
    %120 = arith.extui %119 : vector<2x128xi1> to vector<2x128xi32>
    %121 = arith.sitofp %120 : vector<2x128xi32> to vector<2x128xf32>
    %cst_60 = arith.constant 3.000000e-01 : f32
    %122 = vector.broadcast %cst_60 : f32 to vector<2x128xf32>
    %123 = arith.mulf %122, %84 : vector<2x128xf32>
    %124 = arith.addf %123, %117 : vector<2x128xf32>
    %cst_61 = arith.constant 2.000000e-01 : f32
    %125 = vector.broadcast %cst_61 : f32 to vector<2x128xf32>
    %126 = arith.mulf %121, %125 : vector<2x128xf32>
    %127 = arith.subf %124, %126 : vector<2x128xf32>
    %cst_62 = arith.constant 2.000000e-01 : f32
    %128 = vector.broadcast %cst_62 : f32 to vector<2x128xf32>
    %129 = arith.cmpf ogt, %127, %128 : vector<2x128xf32>
    %130 = arith.extui %129 : vector<2x128xi1> to vector<2x128xi32>
    %131 = arith.sitofp %130 : vector<2x128xi32> to vector<2x128xf32>
    %132 = arith.index_cast %c1_i32 : i32 to index
    %c0_63 = arith.constant 0 : index
    %c0_64 = arith.constant 0 : index
    %133 = vector.load %arg6[%132, %c0_63, %c0_64] : memref<8x2x128xf32, #tpu.memory_space<vmem>>, vector<1x2x128xf32>
    %134 = vector.shape_cast %133 : vector<1x2x128xf32> to vector<2x128xf32>
    %135 = vector.shape_cast %131 : vector<2x128xf32> to vector<1x2x128xf32>
    tpu.vector_store %arg6[%132, %c0_63, %c0_64], %135 {strides = array<i32>} : memref<8x2x128xf32, #tpu.memory_space<vmem>>, vector<1x2x128xf32>,
    %c2_i32 = arith.constant 2 : i32
    %136 = arith.index_cast %c2_i32 : i32 to index
    %c0_65 = arith.constant 0 : index
    %c0_66 = arith.constant 0 : index
    %137 = vector.load %arg12[%136, %c0_65, %c0_66] : memref<8x2x128xf32, #tpu.memory_space<vmem>>, vector<1x2x128xf32>
    %138 = vector.shape_cast %137 : vector<1x2x128xf32> to vector<2x128xf32>
    %139 = arith.index_cast %c2_i32 : i32 to index
    %c0_67 = arith.constant 0 : index
    %c0_68 = arith.constant 0 : index
    %140 = vector.load %arg13[%139, %c0_67, %c0_68] : memref<8x2x128xf32, #tpu.memory_space<vmem>>, vector<1x2x128xf32>
    %141 = vector.shape_cast %140 : vector<1x2x128xf32> to vector<2x128xf32>
    %142 = arith.index_cast %c2_i32 : i32 to index
    %c0_69 = arith.constant 0 : index
    %c0_70 = arith.constant 0 : index
    %143 = vector.load %arg14[%142, %c0_69, %c0_70] : memref<8x2x128xf32, #tpu.memory_space<vmem>>, vector<1x2x128xf32>
    %144 = vector.shape_cast %143 : vector<1x2x128xf32> to vector<2x128xf32>
    %145 = arith.mulf %7, %138 : vector<2x128xf32>
    %146 = arith.mulf %138, %141 : vector<2x128xf32>
    %147 = arith.mulf %144, %105 : vector<2x128xf32>
    %148 = arith.addf %146, %147 : vector<2x128xf32>
    %149 = arith.mulf %144, %107 : vector<2x128xf32>
    %150 = arith.addf %138, %149 : vector<2x128xf32>
    %151 = arith.mulf %145, %141 : vector<2x128xf32>
    %152 = arith.addf %151, %148 : vector<2x128xf32>
    %153 = arith.addf %145, %150 : vector<2x128xf32>
    %cst_71 = arith.constant 9.99999997E-7 : f32
    %154 = vector.broadcast %cst_71 : f32 to vector<2x128xf32>
    %155 = arith.addf %153, %154 : vector<2x128xf32>
    %156 = arith.divf %152, %155 : vector<2x128xf32>
    %157 = arith.index_cast %c2_i32 : i32 to index
    %c0_72 = arith.constant 0 : index
    %c0_73 = arith.constant 0 : index
    %158 = vector.load %arg11[%157, %c0_72, %c0_73] : memref<8x2x128xf32, #tpu.memory_space<vmem>>, vector<1x2x128xf32>
    %159 = vector.shape_cast %158 : vector<1x2x128xf32> to vector<2x128xf32>
    %160 = arith.mulf %159, %156 : vector<2x128xf32>
    %cst_74 = arith.constant 2.000000e-01 : f32
    %161 = vector.broadcast %cst_74 : f32 to vector<2x128xf32>
    %162 = arith.cmpf ogt, %127, %161 : vector<2x128xf32>
    %163 = arith.extui %162 : vector<2x128xi1> to vector<2x128xi32>
    %164 = arith.sitofp %163 : vector<2x128xi32> to vector<2x128xf32>
    %cst_75 = arith.constant 3.000000e-01 : f32
    %165 = vector.broadcast %cst_75 : f32 to vector<2x128xf32>
    %166 = arith.mulf %165, %127 : vector<2x128xf32>
    %167 = arith.addf %166, %160 : vector<2x128xf32>
    %cst_76 = arith.constant 2.000000e-01 : f32
    %168 = vector.broadcast %cst_76 : f32 to vector<2x128xf32>
    %169 = arith.mulf %164, %168 : vector<2x128xf32>
    %170 = arith.subf %167, %169 : vector<2x128xf32>
    %cst_77 = arith.constant 2.000000e-01 : f32
    %171 = vector.broadcast %cst_77 : f32 to vector<2x128xf32>
    %172 = arith.cmpf ogt, %170, %171 : vector<2x128xf32>
    %173 = arith.extui %172 : vector<2x128xi1> to vector<2x128xi32>
    %174 = arith.sitofp %173 : vector<2x128xi32> to vector<2x128xf32>
    %175 = arith.index_cast %c2_i32 : i32 to index
    %c0_78 = arith.constant 0 : index
    %c0_79 = arith.constant 0 : index
    %176 = vector.load %arg6[%175, %c0_78, %c0_79] : memref<8x2x128xf32, #tpu.memory_space<vmem>>, vector<1x2x128xf32>
    %177 = vector.shape_cast %176 : vector<1x2x128xf32> to vector<2x128xf32>
    %178 = vector.shape_cast %174 : vector<2x128xf32> to vector<1x2x128xf32>
    tpu.vector_store %arg6[%175, %c0_78, %c0_79], %178 {strides = array<i32>} : memref<8x2x128xf32, #tpu.memory_space<vmem>>, vector<1x2x128xf32>,
    %c3_i32 = arith.constant 3 : i32
    %179 = arith.index_cast %c3_i32 : i32 to index
    %c0_80 = arith.constant 0 : index
    %c0_81 = arith.constant 0 : index
    %180 = vector.load %arg12[%179, %c0_80, %c0_81] : memref<8x2x128xf32, #tpu.memory_space<vmem>>, vector<1x2x128xf32>
    %181 = vector.shape_cast %180 : vector<1x2x128xf32> to vector<2x128xf32>
    %182 = arith.index_cast %c3_i32 : i32 to index
    %c0_82 = arith.constant 0 : index
    %c0_83 = arith.constant 0 : index
    %183 = vector.load %arg13[%182, %c0_82, %c0_83] : memref<8x2x128xf32, #tpu.memory_space<vmem>>, vector<1x2x128xf32>
    %184 = vector.shape_cast %183 : vector<1x2x128xf32> to vector<2x128xf32>
    %185 = arith.index_cast %c3_i32 : i32 to index
    %c0_84 = arith.constant 0 : index
    %c0_85 = arith.constant 0 : index
    %186 = vector.load %arg14[%185, %c0_84, %c0_85] : memref<8x2x128xf32, #tpu.memory_space<vmem>>, vector<1x2x128xf32>
    %187 = vector.shape_cast %186 : vector<1x2x128xf32> to vector<2x128xf32>
    %188 = arith.mulf %7, %181 : vector<2x128xf32>
    %189 = arith.mulf %181, %184 : vector<2x128xf32>
    %190 = arith.mulf %187, %148 : vector<2x128xf32>
    %191 = arith.addf %189, %190 : vector<2x128xf32>
    %192 = arith.mulf %187, %150 : vector<2x128xf32>
    %193 = arith.addf %181, %192 : vector<2x128xf32>
    %194 = arith.mulf %188, %184 : vector<2x128xf32>
    %195 = arith.addf %194, %191 : vector<2x128xf32>
    %196 = arith.addf %188, %193 : vector<2x128xf32>
    %cst_86 = arith.constant 9.99999997E-7 : f32
    %197 = vector.broadcast %cst_86 : f32 to vector<2x128xf32>
    %198 = arith.addf %196, %197 : vector<2x128xf32>
    %199 = arith.divf %195, %198 : vector<2x128xf32>
    %200 = arith.index_cast %c3_i32 : i32 to index
    %c0_87 = arith.constant 0 : index
    %c0_88 = arith.constant 0 : index
    %201 = vector.load %arg11[%200, %c0_87, %c0_88] : memref<8x2x128xf32, #tpu.memory_space<vmem>>, vector<1x2x128xf32>
    %202 = vector.shape_cast %201 : vector<1x2x128xf32> to vector<2x128xf32>
    %203 = arith.mulf %202, %199 : vector<2x128xf32>
    %cst_89 = arith.constant 2.000000e-01 : f32
    %204 = vector.broadcast %cst_89 : f32 to vector<2x128xf32>
    %205 = arith.cmpf ogt, %170, %204 : vector<2x128xf32>
    %206 = arith.extui %205 : vector<2x128xi1> to vector<2x128xi32>
    %207 = arith.sitofp %206 : vector<2x128xi32> to vector<2x128xf32>
    %cst_90 = arith.constant 3.000000e-01 : f32
    %208 = vector.broadcast %cst_90 : f32 to vector<2x128xf32>
    %209 = arith.mulf %208, %170 : vector<2x128xf32>
    %210 = arith.addf %209, %203 : vector<2x128xf32>
    %cst_91 = arith.constant 2.000000e-01 : f32
    %211 = vector.broadcast %cst_91 : f32 to vector<2x128xf32>
    %212 = arith.mulf %207, %211 : vector<2x128xf32>
    %213 = arith.subf %210, %212 : vector<2x128xf32>
    %cst_92 = arith.constant 2.000000e-01 : f32
    %214 = vector.broadcast %cst_92 : f32 to vector<2x128xf32>
    %215 = arith.cmpf ogt, %213, %214 : vector<2x128xf32>
    %216 = arith.extui %215 : vector<2x128xi1> to vector<2x128xi32>
    %217 = arith.sitofp %216 : vector<2x128xi32> to vector<2x128xf32>
    %218 = arith.index_cast %c3_i32 : i32 to index
    %c0_93 = arith.constant 0 : index
    %c0_94 = arith.constant 0 : index
    %219 = vector.load %arg6[%218, %c0_93, %c0_94] : memref<8x2x128xf32, #tpu.memory_space<vmem>>, vector<1x2x128xf32>
    %220 = vector.shape_cast %219 : vector<1x2x128xf32> to vector<2x128xf32>
    %221 = vector.shape_cast %217 : vector<2x128xf32> to vector<1x2x128xf32>
    tpu.vector_store %arg6[%218, %c0_93, %c0_94], %221 {strides = array<i32>} : memref<8x2x128xf32, #tpu.memory_space<vmem>>, vector<1x2x128xf32>,
    %c4_i32 = arith.constant 4 : i32
    %222 = arith.index_cast %c4_i32 : i32 to index
    %c0_95 = arith.constant 0 : index
    %c0_96 = arith.constant 0 : index
    %223 = vector.load %arg12[%222, %c0_95, %c0_96] : memref<8x2x128xf32, #tpu.memory_space<vmem>>, vector<1x2x128xf32>
    %224 = vector.shape_cast %223 : vector<1x2x128xf32> to vector<2x128xf32>
    %225 = arith.index_cast %c4_i32 : i32 to index
    %c0_97 = arith.constant 0 : index
    %c0_98 = arith.constant 0 : index
    %226 = vector.load %arg13[%225, %c0_97, %c0_98] : memref<8x2x128xf32, #tpu.memory_space<vmem>>, vector<1x2x128xf32>
    %227 = vector.shape_cast %226 : vector<1x2x128xf32> to vector<2x128xf32>
    %228 = arith.index_cast %c4_i32 : i32 to index
    %c0_99 = arith.constant 0 : index
    %c0_100 = arith.constant 0 : index
    %229 = vector.load %arg14[%228, %c0_99, %c0_100] : memref<8x2x128xf32, #tpu.memory_space<vmem>>, vector<1x2x128xf32>
    %230 = vector.shape_cast %229 : vector<1x2x128xf32> to vector<2x128xf32>
    %231 = arith.mulf %7, %224 : vector<2x128xf32>
    %232 = arith.mulf %224, %227 : vector<2x128xf32>
    %233 = arith.mulf %230, %191 : vector<2x128xf32>
    %234 = arith.addf %232, %233 : vector<2x128xf32>
    %235 = arith.mulf %230, %193 : vector<2x128xf32>
    %236 = arith.addf %224, %235 : vector<2x128xf32>
    %237 = arith.mulf %231, %227 : vector<2x128xf32>
    %238 = arith.addf %237, %234 : vector<2x128xf32>
    %239 = arith.addf %231, %236 : vector<2x128xf32>
    %cst_101 = arith.constant 9.99999997E-7 : f32
    %240 = vector.broadcast %cst_101 : f32 to vector<2x128xf32>
    %241 = arith.addf %239, %240 : vector<2x128xf32>
    %242 = arith.divf %238, %241 : vector<2x128xf32>
    %243 = arith.index_cast %c4_i32 : i32 to index
    %c0_102 = arith.constant 0 : index
    %c0_103 = arith.constant 0 : index
    %244 = vector.load %arg11[%243, %c0_102, %c0_103] : memref<8x2x128xf32, #tpu.memory_space<vmem>>, vector<1x2x128xf32>
    %245 = vector.shape_cast %244 : vector<1x2x128xf32> to vector<2x128xf32>
    %246 = arith.mulf %245, %242 : vector<2x128xf32>
    %cst_104 = arith.constant 2.000000e-01 : f32
    %247 = vector.broadcast %cst_104 : f32 to vector<2x128xf32>
    %248 = arith.cmpf ogt, %213, %247 : vector<2x128xf32>
    %249 = arith.extui %248 : vector<2x128xi1> to vector<2x128xi32>
    %250 = arith.sitofp %249 : vector<2x128xi32> to vector<2x128xf32>
    %cst_105 = arith.constant 3.000000e-01 : f32
    %251 = vector.broadcast %cst_105 : f32 to vector<2x128xf32>
    %252 = arith.mulf %251, %213 : vector<2x128xf32>
    %253 = arith.addf %252, %246 : vector<2x128xf32>
    %cst_106 = arith.constant 2.000000e-01 : f32
    %254 = vector.broadcast %cst_106 : f32 to vector<2x128xf32>
    %255 = arith.mulf %250, %254 : vector<2x128xf32>
    %256 = arith.subf %253, %255 : vector<2x128xf32>
    %cst_107 = arith.constant 2.000000e-01 : f32
    %257 = vector.broadcast %cst_107 : f32 to vector<2x128xf32>
    %258 = arith.cmpf ogt, %256, %257 : vector<2x128xf32>
    %259 = arith.extui %258 : vector<2x128xi1> to vector<2x128xi32>
    %260 = arith.sitofp %259 : vector<2x128xi32> to vector<2x128xf32>
    %261 = arith.index_cast %c4_i32 : i32 to index
    %c0_108 = arith.constant 0 : index
    %c0_109 = arith.constant 0 : index
    %262 = vector.load %arg6[%261, %c0_108, %c0_109] : memref<8x2x128xf32, #tpu.memory_space<vmem>>, vector<1x2x128xf32>
    %263 = vector.shape_cast %262 : vector<1x2x128xf32> to vector<2x128xf32>
    %264 = vector.shape_cast %260 : vector<2x128xf32> to vector<1x2x128xf32>
    tpu.vector_store %arg6[%261, %c0_108, %c0_109], %264 {strides = array<i32>} : memref<8x2x128xf32, #tpu.memory_space<vmem>>, vector<1x2x128xf32>,
    %c5_i32 = arith.constant 5 : i32
    %265 = arith.index_cast %c5_i32 : i32 to index
    %c0_110 = arith.constant 0 : index
    %c0_111 = arith.constant 0 : index
    %266 = vector.load %arg12[%265, %c0_110, %c0_111] : memref<8x2x128xf32, #tpu.memory_space<vmem>>, vector<1x2x128xf32>
    %267 = vector.shape_cast %266 : vector<1x2x128xf32> to vector<2x128xf32>
    %268 = arith.index_cast %c5_i32 : i32 to index
    %c0_112 = arith.constant 0 : index
    %c0_113 = arith.constant 0 : index
    %269 = vector.load %arg13[%268, %c0_112, %c0_113] : memref<8x2x128xf32, #tpu.memory_space<vmem>>, vector<1x2x128xf32>
    %270 = vector.shape_cast %269 : vector<1x2x128xf32> to vector<2x128xf32>
    %271 = arith.index_cast %c5_i32 : i32 to index
    %c0_114 = arith.constant 0 : index
    %c0_115 = arith.constant 0 : index
    %272 = vector.load %arg14[%271, %c0_114, %c0_115] : memref<8x2x128xf32, #tpu.memory_space<vmem>>, vector<1x2x128xf32>
    %273 = vector.shape_cast %272 : vector<1x2x128xf32> to vector<2x128xf32>
    %274 = arith.mulf %7, %267 : vector<2x128xf32>
    %275 = arith.mulf %267, %270 : vector<2x128xf32>
    %276 = arith.mulf %273, %234 : vector<2x128xf32>
    %277 = arith.addf %275, %276 : vector<2x128xf32>
    %278 = arith.mulf %273, %236 : vector<2x128xf32>
    %279 = arith.addf %267, %278 : vector<2x128xf32>
    %280 = arith.mulf %274, %270 : vector<2x128xf32>
    %281 = arith.addf %280, %277 : vector<2x128xf32>
    %282 = arith.addf %274, %279 : vector<2x128xf32>
    %cst_116 = arith.constant 9.99999997E-7 : f32
    %283 = vector.broadcast %cst_116 : f32 to vector<2x128xf32>
    %284 = arith.addf %282, %283 : vector<2x128xf32>
    %285 = arith.divf %281, %284 : vector<2x128xf32>
    %286 = arith.index_cast %c5_i32 : i32 to index
    %c0_117 = arith.constant 0 : index
    %c0_118 = arith.constant 0 : index
    %287 = vector.load %arg11[%286, %c0_117, %c0_118] : memref<8x2x128xf32, #tpu.memory_space<vmem>>, vector<1x2x128xf32>
    %288 = vector.shape_cast %287 : vector<1x2x128xf32> to vector<2x128xf32>
    %289 = arith.mulf %288, %285 : vector<2x128xf32>
    %cst_119 = arith.constant 2.000000e-01 : f32
    %290 = vector.broadcast %cst_119 : f32 to vector<2x128xf32>
    %291 = arith.cmpf ogt, %256, %290 : vector<2x128xf32>
    %292 = arith.extui %291 : vector<2x128xi1> to vector<2x128xi32>
    %293 = arith.sitofp %292 : vector<2x128xi32> to vector<2x128xf32>
    %cst_120 = arith.constant 3.000000e-01 : f32
    %294 = vector.broadcast %cst_120 : f32 to vector<2x128xf32>
    %295 = arith.mulf %294, %256 : vector<2x128xf32>
    %296 = arith.addf %295, %289 : vector<2x128xf32>
    %cst_121 = arith.constant 2.000000e-01 : f32
    %297 = vector.broadcast %cst_121 : f32 to vector<2x128xf32>
    %298 = arith.mulf %293, %297 : vector<2x128xf32>
    %299 = arith.subf %296, %298 : vector<2x128xf32>
    %cst_122 = arith.constant 2.000000e-01 : f32
    %300 = vector.broadcast %cst_122 : f32 to vector<2x128xf32>
    %301 = arith.cmpf ogt, %299, %300 : vector<2x128xf32>
    %302 = arith.extui %301 : vector<2x128xi1> to vector<2x128xi32>
    %303 = arith.sitofp %302 : vector<2x128xi32> to vector<2x128xf32>
    %304 = arith.index_cast %c5_i32 : i32 to index
    %c0_123 = arith.constant 0 : index
    %c0_124 = arith.constant 0 : index
    %305 = vector.load %arg6[%304, %c0_123, %c0_124] : memref<8x2x128xf32, #tpu.memory_space<vmem>>, vector<1x2x128xf32>
    %306 = vector.shape_cast %305 : vector<1x2x128xf32> to vector<2x128xf32>
    %307 = vector.shape_cast %303 : vector<2x128xf32> to vector<1x2x128xf32>
    tpu.vector_store %arg6[%304, %c0_123, %c0_124], %307 {strides = array<i32>} : memref<8x2x128xf32, #tpu.memory_space<vmem>>, vector<1x2x128xf32>,
    %c6_i32 = arith.constant 6 : i32
    %308 = arith.index_cast %c6_i32 : i32 to index
    %c0_125 = arith.constant 0 : index
    %c0_126 = arith.constant 0 : index
    %309 = vector.load %arg12[%308, %c0_125, %c0_126] : memref<8x2x128xf32, #tpu.memory_space<vmem>>, vector<1x2x128xf32>
    %310 = vector.shape_cast %309 : vector<1x2x128xf32> to vector<2x128xf32>
    %311 = arith.index_cast %c6_i32 : i32 to index
    %c0_127 = arith.constant 0 : index
    %c0_128 = arith.constant 0 : index
    %312 = vector.load %arg13[%311, %c0_127, %c0_128] : memref<8x2x128xf32, #tpu.memory_space<vmem>>, vector<1x2x128xf32>
    %313 = vector.shape_cast %312 : vector<1x2x128xf32> to vector<2x128xf32>
    %314 = arith.index_cast %c6_i32 : i32 to index
    %c0_129 = arith.constant 0 : index
    %c0_130 = arith.constant 0 : index
    %315 = vector.load %arg14[%314, %c0_129, %c0_130] : memref<8x2x128xf32, #tpu.memory_space<vmem>>, vector<1x2x128xf32>
    %316 = vector.shape_cast %315 : vector<1x2x128xf32> to vector<2x128xf32>
    %317 = arith.mulf %7, %310 : vector<2x128xf32>
    %318 = arith.mulf %310, %313 : vector<2x128xf32>
    %319 = arith.mulf %316, %277 : vector<2x128xf32>
    %320 = arith.addf %318, %319 : vector<2x128xf32>
    %321 = arith.mulf %316, %279 : vector<2x128xf32>
    %322 = arith.addf %310, %321 : vector<2x128xf32>
    %323 = arith.mulf %317, %313 : vector<2x128xf32>
    %324 = arith.addf %323, %320 : vector<2x128xf32>
    %325 = arith.addf %317, %322 : vector<2x128xf32>
    %cst_131 = arith.constant 9.99999997E-7 : f32
    %326 = vector.broadcast %cst_131 : f32 to vector<2x128xf32>
    %327 = arith.addf %325, %326 : vector<2x128xf32>
    %328 = arith.divf %324, %327 : vector<2x128xf32>
    %329 = arith.index_cast %c6_i32 : i32 to index
    %c0_132 = arith.constant 0 : index
    %c0_133 = arith.constant 0 : index
    %330 = vector.load %arg11[%329, %c0_132, %c0_133] : memref<8x2x128xf32, #tpu.memory_space<vmem>>, vector<1x2x128xf32>
    %331 = vector.shape_cast %330 : vector<1x2x128xf32> to vector<2x128xf32>
    %332 = arith.mulf %331, %328 : vector<2x128xf32>
    %cst_134 = arith.constant 2.000000e-01 : f32
    %333 = vector.broadcast %cst_134 : f32 to vector<2x128xf32>
    %334 = arith.cmpf ogt, %299, %333 : vector<2x128xf32>
    %335 = arith.extui %334 : vector<2x128xi1> to vector<2x128xi32>
    %336 = arith.sitofp %335 : vector<2x128xi32> to vector<2x128xf32>
    %cst_135 = arith.constant 3.000000e-01 : f32
    %337 = vector.broadcast %cst_135 : f32 to vector<2x128xf32>
    %338 = arith.mulf %337, %299 : vector<2x128xf32>
    %339 = arith.addf %338, %332 : vector<2x128xf32>
    %cst_136 = arith.constant 2.000000e-01 : f32
    %340 = vector.broadcast %cst_136 : f32 to vector<2x128xf32>
    %341 = arith.mulf %336, %340 : vector<2x128xf32>
    %342 = arith.subf %339, %341 : vector<2x128xf32>
    %cst_137 = arith.constant 2.000000e-01 : f32
    %343 = vector.broadcast %cst_137 : f32 to vector<2x128xf32>
    %344 = arith.cmpf ogt, %342, %343 : vector<2x128xf32>
    %345 = arith.extui %344 : vector<2x128xi1> to vector<2x128xi32>
    %346 = arith.sitofp %345 : vector<2x128xi32> to vector<2x128xf32>
    %347 = arith.index_cast %c6_i32 : i32 to index
    %c0_138 = arith.constant 0 : index
    %c0_139 = arith.constant 0 : index
    %348 = vector.load %arg6[%347, %c0_138, %c0_139] : memref<8x2x128xf32, #tpu.memory_space<vmem>>, vector<1x2x128xf32>
    %349 = vector.shape_cast %348 : vector<1x2x128xf32> to vector<2x128xf32>
    %350 = vector.shape_cast %346 : vector<2x128xf32> to vector<1x2x128xf32>
    tpu.vector_store %arg6[%347, %c0_138, %c0_139], %350 {strides = array<i32>} : memref<8x2x128xf32, #tpu.memory_space<vmem>>, vector<1x2x128xf32>,
    %c7_i32 = arith.constant 7 : i32
    %351 = arith.index_cast %c7_i32 : i32 to index
    %c0_140 = arith.constant 0 : index
    %c0_141 = arith.constant 0 : index
    %352 = vector.load %arg12[%351, %c0_140, %c0_141] : memref<8x2x128xf32, #tpu.memory_space<vmem>>, vector<1x2x128xf32>
    %353 = vector.shape_cast %352 : vector<1x2x128xf32> to vector<2x128xf32>
    %354 = arith.index_cast %c7_i32 : i32 to index
    %c0_142 = arith.constant 0 : index
    %c0_143 = arith.constant 0 : index
    %355 = vector.load %arg13[%354, %c0_142, %c0_143] : memref<8x2x128xf32, #tpu.memory_space<vmem>>, vector<1x2x128xf32>
    %356 = vector.shape_cast %355 : vector<1x2x128xf32> to vector<2x128xf32>
    %357 = arith.index_cast %c7_i32 : i32 to index
    %c0_144 = arith.constant 0 : index
    %c0_145 = arith.constant 0 : index
    %358 = vector.load %arg14[%357, %c0_144, %c0_145] : memref<8x2x128xf32, #tpu.memory_space<vmem>>, vector<1x2x128xf32>
    %359 = vector.shape_cast %358 : vector<1x2x128xf32> to vector<2x128xf32>
    %360 = arith.mulf %7, %353 : vector<2x128xf32>
    %361 = arith.mulf %353, %356 : vector<2x128xf32>
    %362 = arith.mulf %359, %320 : vector<2x128xf32>
    %363 = arith.addf %361, %362 : vector<2x128xf32>
    %364 = arith.mulf %359, %322 : vector<2x128xf32>
    %365 = arith.addf %353, %364 : vector<2x128xf32>
    %366 = arith.mulf %360, %356 : vector<2x128xf32>
    %367 = arith.addf %366, %363 : vector<2x128xf32>
    %368 = arith.addf %360, %365 : vector<2x128xf32>
    %cst_146 = arith.constant 9.99999997E-7 : f32
    %369 = vector.broadcast %cst_146 : f32 to vector<2x128xf32>
    %370 = arith.addf %368, %369 : vector<2x128xf32>
    %371 = arith.divf %367, %370 : vector<2x128xf32>
    %372 = arith.index_cast %c7_i32 : i32 to index
    %c0_147 = arith.constant 0 : index
    %c0_148 = arith.constant 0 : index
    %373 = vector.load %arg11[%372, %c0_147, %c0_148] : memref<8x2x128xf32, #tpu.memory_space<vmem>>, vector<1x2x128xf32>
    %374 = vector.shape_cast %373 : vector<1x2x128xf32> to vector<2x128xf32>
    %375 = arith.mulf %374, %371 : vector<2x128xf32>
    %cst_149 = arith.constant 2.000000e-01 : f32
    %376 = vector.broadcast %cst_149 : f32 to vector<2x128xf32>
    %377 = arith.cmpf ogt, %342, %376 : vector<2x128xf32>
    %378 = arith.extui %377 : vector<2x128xi1> to vector<2x128xi32>
    %379 = arith.sitofp %378 : vector<2x128xi32> to vector<2x128xf32>
    %cst_150 = arith.constant 3.000000e-01 : f32
    %380 = vector.broadcast %cst_150 : f32 to vector<2x128xf32>
    %381 = arith.mulf %380, %342 : vector<2x128xf32>
    %382 = arith.addf %381, %375 : vector<2x128xf32>
    %cst_151 = arith.constant 2.000000e-01 : f32
    %383 = vector.broadcast %cst_151 : f32 to vector<2x128xf32>
    %384 = arith.mulf %379, %383 : vector<2x128xf32>
    %385 = arith.subf %382, %384 : vector<2x128xf32>
    %cst_152 = arith.constant 2.000000e-01 : f32
    %386 = vector.broadcast %cst_152 : f32 to vector<2x128xf32>
    %387 = arith.cmpf ogt, %385, %386 : vector<2x128xf32>
    %388 = arith.extui %387 : vector<2x128xi1> to vector<2x128xi32>
    %389 = arith.sitofp %388 : vector<2x128xi32> to vector<2x128xf32>
    %390 = arith.index_cast %c7_i32 : i32 to index
    %c0_153 = arith.constant 0 : index
    %c0_154 = arith.constant 0 : index
    %391 = vector.load %arg6[%390, %c0_153, %c0_154] : memref<8x2x128xf32, #tpu.memory_space<vmem>>, vector<1x2x128xf32>
    %392 = vector.shape_cast %391 : vector<1x2x128xf32> to vector<2x128xf32>
    %393 = vector.shape_cast %389 : vector<2x128xf32> to vector<1x2x128xf32>
    tpu.vector_store %arg6[%390, %c0_153, %c0_154], %393 {strides = array<i32>} : memref<8x2x128xf32, #tpu.memory_space<vmem>>, vector<1x2x128xf32>,
    %c8_i32 = arith.constant 8 : i32
    %c0_155 = arith.constant 0 : index
    %c0_156 = arith.constant 0 : index
    %394 = vector.load %arg7[%c0_155, %c0_156] : memref<2x128xf32, #tpu.memory_space<vmem>>, vector<2x128xf32>
    tpu.vector_store %arg7[%c0_155, %c0_156], %363 {strides = array<i32>} : memref<2x128xf32, #tpu.memory_space<vmem>>, vector<2x128xf32>,
    %c0_157 = arith.constant 0 : index
    %c0_158 = arith.constant 0 : index
    %395 = vector.load %arg8[%c0_157, %c0_158] : memref<2x128xf32, #tpu.memory_space<vmem>>, vector<2x128xf32>
    tpu.vector_store %arg8[%c0_157, %c0_158], %365 {strides = array<i32>} : memref<2x128xf32, #tpu.memory_space<vmem>>, vector<2x128xf32>,
    %c0_159 = arith.constant 0 : index
    %c0_160 = arith.constant 0 : index
    %396 = vector.load %arg9[%c0_159, %c0_160] : memref<2x128xf32, #tpu.memory_space<vmem>>, vector<2x128xf32>
    tpu.vector_store %arg9[%c0_159, %c0_160], %385 {strides = array<i32>} : memref<2x128xf32, #tpu.memory_space<vmem>>, vector<2x128xf32>,
    return
  }
  func.func @transform_0(%arg0: i32, %arg1: i32) -> (i32, i32, i32) {
    %c0_i32 = arith.constant 0 : i32
    %c0_i32_0 = arith.constant 0 : i32
    return %arg1, %arg0, %c0_i32 : i32, i32, i32
  }
  func.func @transform_1(%arg0: i32, %arg1: i32) -> (i32, i32) {
    %c0_i32 = arith.constant 0 : i32
    %c0_i32_0 = arith.constant 0 : i32
    %c0_i32_1 = arith.constant 0 : i32
    return %c0_i32, %c0_i32_0 : i32, i32
  }
  func.func @transform_2(%arg0: i32, %arg1: i32) -> (i32, i32) {
    %c0_i32 = arith.constant 0 : i32
    %c0_i32_0 = arith.constant 0 : i32
    %c0_i32_1 = arith.constant 0 : i32
    return %c0_i32, %c0_i32_0 : i32, i32
  }
  func.func @transform_3(%arg0: i32, %arg1: i32) -> (i32, i32) {
    %c0_i32 = arith.constant 0 : i32
    %c0_i32_0 = arith.constant 0 : i32
    %c0_i32_1 = arith.constant 0 : i32
    return %c0_i32, %c0_i32_0 : i32, i32
  }
  func.func @transform_4(%arg0: i32, %arg1: i32) -> (i32, i32, i32) {
    %c0_i32 = arith.constant 0 : i32
    %c0_i32_0 = arith.constant 0 : i32
    return %arg1, %arg0, %c0_i32 : i32, i32, i32
  }
}

</mosaic_0001>

<bundles_post_ra>
// kernel: tpu_custom_call.1
= control target key start
LH: loop header
LB: loop body
LE: loop exit
PB: predicated region body
PF: predicated region fallthrough
CT: control target
= control target key end

     0   :  { %9 = vsyncpa [#allocation11], 0  ;;  %s1516_s0 = inlined_call_operand.hbm [shape: f32[8,2,128], index: 0, kind: input, shape index: {}]   ;;  %s1517_s1 = inlined_call_operand.vmem [shape: f32[1,128], index: 1, kind: input, shape index: {}]   ;;  %s1518_s2 = inlined_call_operand.hbm [shape: bf16[128,512], index: 2, kind: input, shape index: {}]   ;;  %s1519_s3 = inlined_call_operand.vmem [shape: f32[1,128], index: 3, kind: input, shape index: {}]   ;;  %s1520_s4 = inlined_call_operand.hbm [shape: f32[8,2,128], index: 4, kind: output, shape index: {}]  }
   0x1   :  { %10 = vsyncpa [#allocation14], 0 }
   0x2   :  { %11 = vsyncpa [#allocation12], 0  ;;  %s1286_s15 = smov [#allocation10]   ;;  %s1214_s19 = scalar_lea.hbm %s1516_s0, 256 }
   0x3   :  { %s17_s16 = sshll.u32 %s1286_s15, 4  ;;  %p1215_p0 = scmp.ne.s32.totalorder %s1516_s0, %s1214_s19  ;;  %s18_s16 = int_to_ptr.vmem [resolvable:$true] %s17_s16 }
   0x4   :  { %p1218_p1 = scmp.lt.u32.totalorder %s1214_s19, %s1516_s0 }
   0x6   :  { %p1220_p2 = pnand %p1218_p1, %p1215_p0 }
   0x8   :  { %1223 = shalt.err (!%p1220_p2)
}
   0x9   :  { %s1224_s24 = scalar_lea.vmem %s18_s16, 256  ;;  %p1229_p4 = scmp.lt.s32.totalorder %s18_s16, %s18_s16 }
   0xa   :  { %p1225_p3 = scmp.ne.s32.totalorder %s18_s16, %s1224_s24  ;;  %p1230_p5 = scmp.lt.s32.totalorder %s1224_s24, %s1224_s24 }
   0xc   :  { %p1231_p6 = por %p1230_p5, %p1229_p4 }
   0xe   :  { %p1232_p7 = pnand %p1231_p6, %p1225_p3 }
  0x10   :  { %1235 = shalt.err (!%p1232_p7)
}
  0x11   :  { %s1287_s25 = smov 32   ;;  %s1288_s26 = smov 2  }
  0x12   :  { %23 = dma.hbm_to_vmem [thread:$0]  %s1516_s0, 256, %s18_s16, [#allocation11], %s1287_s25, %s1287_s25, %s1288_s26  }
  0x13   :  { %s1289_s29 = smov [#allocation13]   ;;  %s1236_s7 = scalar_lea.hbm %s1518_s2, 4096 }
  0x14   :  { %s31_s30 = sshll.u32 %s1289_s29, 4  ;;  %p1237_p8 = scmp.ne.s32.totalorder %s1518_s2, %s1236_s7  ;;  %s32_s30 = int_to_ptr.vmem [resolvable:$true] %s31_s30 }
  0x15   :  { %p1240_p9 = scmp.lt.u32.totalorder %s1236_s7, %s1518_s2 }
  0x17   :  { %p1242_p10 = pnand %p1240_p9, %p1237_p8 }
  0x19   :  { %1245 = shalt.err (!%p1242_p10)
}
  0x1a   :  { %s1246_s12 = scalar_lea.vmem %s32_s30, 4096  ;;  %p1251_p12 = scmp.lt.s32.totalorder %s32_s30, %s32_s30 }
  0x1b   :  { %p1247_p11 = scmp.ne.s32.totalorder %s32_s30, %s1246_s12  ;;  %p1252_p13 = scmp.lt.s32.totalorder %s1246_s12, %s1246_s12 }
  0x1d   :  { %p1253_p0 = por %p1252_p13, %p1251_p12 }
  0x1f   :  { %p1254_p1 = pnand %p1253_p0, %p1247_p11 }
  0x21   :  { %1257 = shalt.err (!%p1254_p1)
}
  0x22   :  { %s1290_s0 = smov 256   ;;  %s1291_s13 = smov 16  }
  0x23   :  { %37 = dma.hbm_to_vmem [thread:$0]  %s1518_s2, 4096, %s32_s30, [#allocation14], %s1290_s0, %s1290_s0, %s1291_s13  }
  0x24   :  { %1280 = dma.done.wait [#allocation11], 256  }
  0x25   :  { %1281 = vsyncadd [#allocation11], 4294967040 }
  0x26   :  { %1282 = dma.done.wait [#allocation14], 4096  }
  0x27   :  { %1283 = vsyncadd [#allocation14], 4294963200  ;;  %v1292_v0 = vmov 0   ;;  %v1293_v1 = vmov 0.0   ;;  %v1084_v2 = vld [vmem:[#allocation13 + $0x4] ss:$16 sps:$4 sm:$0xff]   ;;  %v60_v16 = vlaneseq }
  0x28   :  { %381 = vmatprep.mubr.bf16.mxu0 %v1292_v0  ;;  %424 = vmatprep.mubr.bf16.mxu1 %v1292_v0  ;;  %54 = vst [vmem:[#allocation5] sm:$0x3] %v1293_v1  ;;  %51 = vst [vmem:[#allocation2] sm:$0x3] %v1293_v1  ;;  %v1086_v3 = vld [vmem:[#allocation13 + $0xc] ss:$16 sps:$4 sm:$0xff]  }
  0x29   :  { %52 = vst [vmem:[#allocation3] sm:$0x3] %v1293_v1  ;;  %53 = vst [vmem:[#allocation4] sm:$0x3] %v1293_v1  ;;  %349 = vmatprep.subr.bf16.mxu0 %v1084_v2  ;;  %v1088_v4 = vld [vmem:[#allocation13] ss:$16 sps:$4 sm:$0xff]   ;;  %392 = vmatprep.subr.bf16.mxu1 %v1086_v3 }
  0x2a   :  { %v1089_v5 = vld [vmem:[#allocation13 + $0x8] ss:$16 sps:$4 sm:$0xff]   ;;  %v1090_v6 = vld [vmem:[#allocation13 + $0x24] ss:$16 sps:$4 sm:$0xff]   ;;  %350 = vmatpush1.bf16.msra.mxu0 %v1088_v4  ;;  %v1092_v7 = vld [vmem:[#allocation13 + $0x2c] ss:$16 sps:$4 sm:$0xff]  }
  0x2b   :  { %393 = vmatpush1.bf16.msra.mxu1 %v1089_v5  ;;  %v1094_v8 = vld [vmem:[#allocation13 + $0x20] ss:$16 sps:$4 sm:$0xff]   ;;  %351 = vmatprep.subr.bf16.mxu0 %v1090_v6  ;;  %v1095_v9 = vld [vmem:[#allocation13 + $0x28] ss:$16 sps:$4 sm:$0xff]   ;;  %v1096_v10 = vld [vmem:[#allocation13 + $0x44] ss:$16 sps:$4 sm:$0xff]  }
  0x2c   :  { %394 = vmatprep.subr.bf16.mxu1 %v1092_v7  ;;  %v1098_v11 = vld [vmem:[#allocation13 + $0x4c] ss:$16 sps:$4 sm:$0xff]   ;;  %v1100_v12 = vld [vmem:[#allocation13 + $0x40] ss:$16 sps:$4 sm:$0xff]   ;;  %v1101_v13 = vld [vmem:[#allocation13 + $0x48] ss:$16 sps:$4 sm:$0xff]  }
  0x2d   :  { %v1102_v14 = vld [vmem:[#allocation13 + $0x64] ss:$16 sps:$4 sm:$0xff]   ;;  %v1104_v15 = vld [vmem:[#allocation13 + $0x6c] ss:$16 sps:$4 sm:$0xff]   ;;  %v1106_v17 = vld [vmem:[#allocation13 + $0x60] ss:$16 sps:$4 sm:$0xff]  }
  0x2e   :  { %352 = vmatpush1.bf16.msra.mxu0 %v1094_v8  ;;  %v1107_v18 = vld [vmem:[#allocation13 + $0x68] ss:$16 sps:$4 sm:$0xff]   ;;  %v1108_v19 = vld [vmem:[#allocation13 + $0x84] ss:$16 sps:$4 sm:$0xff]   ;;  %v1110_v20 = vld [vmem:[#allocation13 + $0x8c] ss:$16 sps:$4 sm:$0xff]  }
  0x2f   :  { %395 = vmatpush1.bf16.msra.mxu1 %v1095_v9  ;;  %353 = vmatprep.subr.bf16.mxu0 %v1096_v10  ;;  %v61_v21 = vshrl.u32 %v60_v16, 7  ;;  %v1112_v22 = vld [vmem:[#allocation13 + $0x80] ss:$16 sps:$4 sm:$0xff]   ;;  %v1113_v23 = vld [vmem:[#allocation13 + $0x88] ss:$16 sps:$4 sm:$0xff]  }
  0x30   :  { %396 = vmatprep.subr.bf16.mxu1 %v1098_v11  ;;  %v1114_v24 = vld [vmem:[#allocation13 + $0xa4] ss:$16 sps:$4 sm:$0xff]   ;;  %v1116_v25 = vld [vmem:[#allocation13 + $0xac] ss:$16 sps:$4 sm:$0xff]   ;;  %v1294_v27 = vmov 1983009808  }
  0x31   :  { %v1352_v26 = vsub.s32 0, %v61_v21  ;;  %v123_v28 = vunpack.c.l.s4 %v1294_v27  ;;  %v1118_v29 = vld [vmem:[#allocation13 + $0xa0] ss:$16 sps:$4 sm:$0xff]   ;;  %v1119_v30 = vld [vmem:[#allocation13 + $0xa8] ss:$16 sps:$4 sm:$0xff]  }
  0x32   :  { %354 = vmatpush1.bf16.msra.mxu0 %v1100_v12  ;;  %v1120_v31 = vld [vmem:[#allocation13 + $0xc4] ss:$16 sps:$4 sm:$0xff]   ;;  %v1122_v32 = vld [vmem:[#allocation13 + $0xcc] ss:$16 sps:$4 sm:$0xff]   ;;  %v55_v33 = vld [vmem:[%s1517_s1] sm:$0x1] }
  0x33   :  { %397 = vmatpush1.bf16.msra.mxu1 %v1101_v13  ;;  %355 = vmatprep.subr.bf16.mxu0 %v1102_v14  ;;  %v1124_v34 = vld [vmem:[#allocation13 + $0xc0] ss:$16 sps:$4 sm:$0xff]   ;;  %v1125_v35 = vld [vmem:[#allocation13 + $0xc8] ss:$16 sps:$4 sm:$0xff]   ;;  %v78_v37 = vrot.slane %v55_v33, %v1352_v26  ;;  %v124_v38 = vunpack.c.0.s8 %v123_v28  ;;  %v1126_v39 = vld [vmem:[#allocation13 + $0xe4] ss:$16 sps:$4 sm:$0xff]  }
  0x34   :  { %398 = vmatprep.subr.bf16.mxu1 %v1104_v15  ;;  %v65_v36 = vld [vmem:[#allocation10] sm:$0x3]  ;;  %v1128_v40 = vld [vmem:[#allocation13 + $0xec] ss:$16 sps:$4 sm:$0xff]   ;;  %v66_v41 = vld [vmem:[#allocation10 + $0x2] sm:$0x3] }
  0x35   :  { %v67_v42 = vld [vmem:[#allocation10 + $0x4] sm:$0x3]  ;;  %v68_v43 = vld [vmem:[#allocation10 + $0x6] sm:$0x3]  ;;  %v69_v44 = vld [vmem:[#allocation10 + $0x8] sm:$0x3]  ;;  %v80_v50 = vmul.f32 %v78_v37, %v65_v36  ;;  %v81_v51 = vmul.f32 %v78_v37, %v66_v41  ;;  %v1358_v52 = vsub.s32 %v124_v38, %v61_v21 }
  0x36   :  { %356 = vmatpush1.bf16.msra.mxu0 %v1106_v17  ;;  %v70_v45 = vld [vmem:[#allocation10 + $0xa] sm:$0x3]  ;;  %v71_v46 = vld [vmem:[#allocation10 + $0xc] sm:$0x3]  ;;  %v72_v47 = vld [vmem:[#allocation10 + $0xe] sm:$0x3]  ;;  %v82_v53 = vmul.f32 %v78_v37, %v67_v42  ;;  %v83_v54 = vmul.f32 %v78_v37, %v68_v43  ;;  %v84_v55 = vmul.f32 %v78_v37, %v69_v44 }
  0x37   :  { %399 = vmatpush1.bf16.msra.mxu1 %v1107_v18  ;;  %357 = vmatprep.subr.bf16.mxu0 %v1108_v19  ;;  %v73_v48 = vld [vmem:[#allocation5] sm:$0x3]  ;;  %v88_v49 = vsub.f32 1.0, %v55_v33  ;;  %v1130_v57 = vld [vmem:[#allocation13 + $0xe0] ss:$16 sps:$4 sm:$0xff]   ;;  %v85_v59 = vmul.f32 %v78_v37, %v70_v45  ;;  %v86_v60 = vmul.f32 %v78_v37, %v71_v46  ;;  %v87_v61 = vmul.f32 %v78_v37, %v72_v47 }
  0x38   :  { %400 = vmatprep.subr.bf16.mxu1 %v1110_v20  ;;  %111 = vst [vmem:[#allocation5] sm:$0x3] %v72_v47  ;;  %v1131_v58 = vld [vmem:[#allocation13 + $0xe8] ss:$16 sps:$4 sm:$0xff]  }
  0x39   :  { %v93_v56 = vrot.slane %v88_v49, %v1352_v26  ;;  %v56_v27 = vld [vmem:[%s1519_s3] sm:$0x1]  ;;  %s1295_s3 = smov [#allocation15]  }
  0x3a   :  { %358 = vmatpush1.bf16.msra.mxu0 %v1112_v22  ;;  %v57_v38 = vmul.f32 1.442695, %v56_v27  ;;  %s996_s18 = sshll.u32 %s1295_s3, 4  ;;  %s997_s18 = int_to_ptr.vmem [resolvable:$true] %s996_s18 }
  0x3b   :  { %401 = vmatpush1.bf16.msra.mxu1 %v1113_v23  ;;  %359 = vmatprep.subr.bf16.mxu0 %v1114_v24  ;;  %v95_v62 = vmul.f32 %v93_v56, %v73_v48  ;;  %v96_v63 = vmul.f32 %v93_v56, %v65_v36  ;;  %v97_v0 = vmul.f32 %v93_v56, %v66_v41  ;;  %s1258_s19 = scalar_lea.vmem %s997_s18, 256  ;;  %p1263_p3 = scmp.lt.s32.totalorder %s997_s18, %s997_s18 }
  0x3c   :  { %402 = vmatprep.subr.bf16.mxu1 %v1116_v25  ;;  %v98_v2 = vmul.f32 %v93_v56, %v67_v42  ;;  %v99_v3 = vmul.f32 %v93_v56, %v68_v43  ;;  %v100_v4 = vmul.f32 %v93_v56, %v69_v44  ;;  %v101_v5 = vmul.f32 %v93_v56, %v70_v45  ;;  %p1259_p2 = scmp.ne.s32.totalorder %s997_s18, %s1258_s19  ;;  %p1264_p4 = scmp.lt.s32.totalorder %s1258_s19, %s1258_s19 }
  0x3d   :  { %v102_v6 = vmul.f32 %v93_v56, %v71_v46  ;;  %v103_v7 = vadd.f32 %v95_v62, %v80_v50  ;;  %v104_v8 = vadd.f32 %v96_v63, %v81_v51  ;;  %v105_v9 = vadd.f32 %v97_v0, %v82_v53 }
  0x3e   :  { %360 = vmatpush1.bf16.msra.mxu0 %v1118_v29  ;;  %v106_v10 = vadd.f32 %v98_v2, %v83_v54  ;;  %v107_v11 = vadd.f32 %v99_v3, %v84_v55  ;;  %v108_v12 = vadd.f32 %v100_v4, %v85_v59  ;;  %v109_v13 = vadd.f32 %v101_v5, %v86_v60  ;;  %p1265_p5 = por %p1264_p4, %p1263_p3 }
  0x3f   :  { %403 = vmatpush1.bf16.msra.mxu1 %v1119_v30  ;;  %361 = vmatprep.subr.bf16.mxu0 %v1120_v31  ;;  %v110_v14 = vadd.f32 %v102_v6, %v87_v61  ;;  %v120_v15 = vcombine.low %v103_v7, %v104_v8 }
  0x40   :  { %404 = vmatprep.subr.bf16.mxu1 %v1122_v32  ;;  %v121_v16 = vcombine.low %v105_v9, %v106_v10  ;;  %v137_v17 = vcombine.low %v107_v11, %v108_v12  ;;  %p1266_p6 = pnand %p1265_p5, %p1259_p2 }
  0x41   :  { %v128_v18 = vrot.slane %v120_v15, %v1358_v52  ;;  %v138_v19 = vcombine.low %v109_v13, %v110_v14 }
  0x42   :  { %362 = vmatpush1.bf16.msra.mxu0 %v1124_v34  ;;  %v135_v20 = vrot.slane %v121_v16, %v1358_v52  ;;  %v145_v21 = vrot.slane %v137_v17, %v1358_v52 }
  0x43   :  { %405 = vmatpush1.bf16.msra.mxu1 %v1125_v35  ;;  %363 = vmatprep.subr.bf16.mxu0 %v1126_v39  ;;  %v152_v22 = vrot.slane %v138_v19, %v1358_v52 }
  0x44   :  { %406 = vmatprep.subr.bf16.mxu1 %v1128_v40  ;;  %v136_v23 = vcombine.low %v128_v18, %v135_v20 }
  0x45   :  { %v153_v24 = vcombine.low %v145_v21, %v152_v22 }
  0x46   :  { %364 = vmatpush1.bf16.msra.mxu0 %v1130_v57 }
  0x47   :  { %407 = vmatpush1.bf16.msra.mxu1 %v1131_v58  ;;  %v156_v25 = vpack.c.bf16 %v153_v24, %v136_v23 }
  0x49   :  { %382 = vmatmul.mubr.bf16.vlgmr.msra.gmra.mrb[0].mxu0 %v156_v25 }
  0x4a   :  { %425 = vmatmul.mubr.bf16.vlgmr.msra.gmra.mrb[0].mxu1 %v156_v25 }
 0x11c   :  { %v383_v28 = vpop.f32.mrb[0].mxu0 }
 0x11d   :  { %v426_v29 = vpop.f32.mrb[0].mxu1  ;;  %v385_v30 = vpop.f32.mrb[1].mxu0 }
 0x11e   :  { %v428_v31 = vpop.f32.mrb[1].mxu1  ;;  %v443_v32 = vcombine.low %v383_v28, %v385_v30  ;;  %v444_v33 = vcombine.high %v383_v28, %v385_v30  ;;  %v387_v36 = vpop.f32.mrb[2].mxu0 }
 0x11f   :  { %v445_v34 = vcombine.low %v426_v29, %v428_v31  ;;  %v446_v35 = vcombine.high %v426_v29, %v428_v31  ;;  %v430_v37 = vpop.f32.mrb[2].mxu1  ;;  %v389_v39 = vpop.f32.mrb[3].mxu0 }
 0x120   :  { %v432_v40 = vpop.f32.mrb[3].mxu1  ;;  %v453_v41 = vrot.slane %v443_v32, %v1358_v52  ;;  %v460_v42 = vrot.slane %v444_v33, %v1358_v52  ;;  %v479_v45 = vcombine.low %v387_v36, %v389_v39  ;;  %v480_v46 = vcombine.high %v387_v36, %v389_v39 }
 0x121   :  { %v467_v43 = vrot.slane %v445_v34, %v1358_v52  ;;  %v474_v44 = vrot.slane %v446_v35, %v1358_v52  ;;  %v481_v47 = vcombine.low %v430_v37, %v432_v40  ;;  %v482_v48 = vcombine.high %v430_v37, %v432_v40 }
 0x122   :  { %v489_v61 = vrot.slane %v479_v45, %v1358_v52  ;;  %v496_v16 = vrot.slane %v480_v46, %v1358_v52 }
 0x123   :  { %v475_v49 = vcombine.low %v453_v41, %v467_v43  ;;  %v476_v50 = vcombine.high %v453_v41, %v467_v43  ;;  %v477_v51 = vcombine.low %v460_v42, %v474_v44  ;;  %v478_v53 = vcombine.high %v460_v42, %v474_v44 }
 0x124   :  { %v1049_v54 = vcombine.low %v467_v43, %v467_v43  ;;  %v1050_v55 = vcombine.high %v467_v43, %v467_v43  ;;  %v1051_v56 = vcombine.low %v474_v44, %v474_v44  ;;  %v1052_v57 = vcombine.high %v474_v44, %v474_v44 }
 0x125   :  { %v1041_v58 = vmul.f32 -1.442695, %v475_v49  ;;  %v1042_v59 = vmul.f32 -1.442695, %v476_v50  ;;  %v1043_v60 = vmul.f32 -1.442695, %v477_v51  ;;  %v503_v19 = vrot.slane %v481_v47, %v1358_v52 }
 0x126   :  { %v1044_v62 = vmul.f32 -1.442695, %v478_v53  ;;  %v579_v63 = vrot.slane %v475_v49, 2  ;;  %v580_v0 = vrot.slane %v476_v50, 2  ;;  %v581_v2 = vrot.slane %v477_v51, 2 }
 0x127   :  { %1057 = vst.sshfl [vmem:[#allocation8] sm:$0x3 pattern:$0x76325410] %v1049_v54  ;;  %1132 = vpow2.f32 %v1041_v58  ;;  %v582_v3 = vrot.slane %v478_v53, 2  ;;  %v707_v4 = vrot.slane %v475_v49, 6  ;;  %v510_v22 = vrot.slane %v482_v48, %v1358_v52 }
 0x128   :  { %1058 = vst.sshfl [vmem:[#allocation8 + $0x2] sm:$0x3 pattern:$0x76325410] %v1050_v55  ;;  %v708_v5 = vrot.slane %v476_v50, 6  ;;  %1134 = vpow2.f32 %v1042_v59  ;;  %v595_v6 = vmin.f32 %v579_v63, 10.0  ;;  %v1376_v23 = vcombine.low %v489_v61, %v503_v19 }
 0x129   :  { %1059 = vst.sshfl [vmem:[#allocation8 + $0x4] sm:$0x3 pattern:$0x76325410] %v1051_v56  ;;  %v596_v7 = vmin.f32 %v580_v0, 10.0  ;;  %v597_v8 = vmin.f32 %v581_v2, 10.0  ;;  %1136 = vpow2.f32 %v1043_v60  ;;  %v1378_v24 = vcombine.high %v489_v61, %v503_v19 }
 0x12a   :  { %1060 = vst.sshfl [vmem:[#allocation8 + $0x6] sm:$0x3 pattern:$0x76325410] %v1052_v57  ;;  %v598_v9 = vmin.f32 %v582_v3, 10.0  ;;  %v709_v10 = vrot.slane %v477_v51, 6  ;;  %1138 = vpow2.f32 %v1044_v62  ;;  %v1053_v25 = vcombine.low %v503_v19, %v503_v19 }
 0x12b   :  { %v710_v11 = vrot.slane %v478_v53, 6  ;;  %v603_v12 = vmul.f32 1.442695, %v595_v6  ;;  %v605_v13 = vmul.f32 1.442695, %v596_v7  ;;  %1140 = vpow2.f32 %v57_v38 }
 0x12c   :  { %v607_v14 = vmul.f32 1.442695, %v597_v8  ;;  %v609_v15 = vmul.f32 1.442695, %v598_v9  ;;  %v723_v17 = vmul.f32 1.442695, %v707_v4  ;;  %v1380_v27 = vcombine.low %v496_v16, %v510_v22 }
 0x12d   :  { %1142 = vpow2.f32 %v603_v12  ;;  %v725_v18 = vmul.f32 1.442695, %v708_v5  ;;  %v727_v20 = vmul.f32 1.442695, %v709_v10  ;;  %v729_v21 = vmul.f32 1.442695, %v710_v11 }
 0x12e   :  { %1144 = vpow2.f32 %v605_v13  ;;  %v1382_v28 = vcombine.high %v496_v16, %v510_v22  ;;  %v1054_v29 = vcombine.high %v503_v19, %v503_v19  ;;  %v583_v30 = vrot.slane %v1376_v23, 2  ;;  %1061 = vst.sshfl [vmem:[#allocation8 + $0x8] sm:$0x3 pattern:$0x76325410] %v1053_v25 }
 0x12f   :  { %1146 = vpow2.f32 %v607_v14  ;;  %v584_v52 = vrot.slane %v1378_v24, 2  ;;  %v585_v34 = vrot.slane %v1380_v27, 2  ;;  %v1045_v40 = vmul.f32 -1.442695, %v1376_v23  ;;  %v748_v16 = vld [vmem:[#allocation3] sm:$0x3] }
 0x130   :  { %1148 = vpow2.f32 %v609_v15  ;;  %1062 = vst.sshfl [vmem:[#allocation8 + $0xa] sm:$0x3 pattern:$0x76325410] %v1054_v29  ;;  %v586_v37 = vrot.slane %v1382_v28, 2  ;;  %v599_v41 = vmin.f32 %v583_v30, 10.0  ;;  %v1055_v49 = vcombine.low %v510_v22, %v510_v22 }
 0x131   :  { %1150 = vpow2.f32 %v723_v17  ;;  %v1133_v31 = vpop.eup %1132  ;;  %v1046_v44 = vmul.f32 -1.442695, %v1378_v24  ;;  %v600_v45 = vmin.f32 %v584_v52, 10.0  ;;  %v1047_v47 = vmul.f32 -1.442695, %v1380_v27 }
 0x132   :  { %1152 = vpow2.f32 %v725_v18  ;;  %v1135_v32 = vpop.eup %1134  ;;  %v547_v33 = vadd.f32 1.0, %v1133_v31  ;;  %v601_v48 = vmin.f32 %v585_v34, 10.0  ;;  %v1048_v51 = vmul.f32 -1.442695, %v1382_v28  ;;  %v747_v15 = vld [vmem:[#allocation2] sm:$0x3] }
 0x133   :  { %1154 = vpow2.f32 %v727_v20  ;;  %v1137_v35 = vpop.eup %1136  ;;  %v548_v36 = vadd.f32 1.0, %v1135_v32  ;;  %v602_v53 = vmin.f32 %v586_v37, 10.0  ;;  %v1056_v54 = vcombine.high %v510_v22, %v510_v22  ;;  %1063 = vst.sshfl [vmem:[#allocation8 + $0xc] sm:$0x3 pattern:$0x76325410] %v1055_v49 }
 0x134   :  { %1156 = vpow2.f32 %v729_v21  ;;  %v1139_v38 = vpop.eup %1138  ;;  %v549_v39 = vadd.f32 1.0, %v1137_v35  ;;  %v611_v56 = vmul.f32 1.442695, %v599_v41  ;;  %v711_v57 = vrot.slane %v1376_v23, 6  ;;  %v1399_v17 = vld [vmem:[#allocation8] sm:$0x3] }
 0x135   :  { %1158 = vrcp.f32 %v547_v33  ;;  %v1141_v42 = vpop.eup %1140  ;;  %v550_v43 = vadd.f32 1.0, %v1139_v38  ;;  %v613_v59 = vmul.f32 1.442695, %v600_v45  ;;  %v712_v60 = vrot.slane %v1378_v24, 6  ;;  %v1407_v35 = vld [vmem:[#allocation8 + $0x2] sm:$0x3] }
 0x136   :  { %1160 = vrcp.f32 %v548_v36  ;;  %1064 = vst.sshfl [vmem:[#allocation8 + $0xe] sm:$0x3 pattern:$0x76325410] %v1056_v54  ;;  %v615_v62 = vmul.f32 1.442695, %v601_v48  ;;  %v1397_v9 = vrot.slane %v1141_v42, %v1352_v26 }
 0x137   :  { %v1143_v46 = vpop.eup %1142  ;;  %1162 = vrcp.f32 %v549_v39  ;;  %v713_v63 = vrot.slane %v1380_v27, 6  ;;  %v617_v2 = vmul.f32 1.442695, %v602_v53  ;;  %v714_v3 = vrot.slane %v1382_v28, 6 }
 0x138   :  { %v1145_v50 = vpop.eup %1144  ;;  %1164 = vrcp.f32 %v550_v43  ;;  %619 = vst [vmem:[#allocation7] sm:$0x3] %v1143_v46  ;;  %v731_v5 = vmul.f32 1.442695, %v711_v57  ;;  %v733_v7 = vmul.f32 1.442695, %v712_v60 }
 0x139   :  { %v1147_v55 = vpop.eup %1146  ;;  %620 = vst [vmem:[#allocation7 + $0x2] sm:$0x3] %v1145_v50  ;;  %1166 = vpow2.f32 %v1045_v40  ;;  %v735_v10 = vmul.f32 1.442695, %v713_v63  ;;  %v737_v13 = vmul.f32 1.442695, %v714_v3 }
 0x13a   :  { %v1149_v58 = vpop.eup %1148  ;;  %621 = vst [vmem:[#allocation7 + $0x4] sm:$0x3] %v1147_v55  ;;  %1168 = vpow2.f32 %v1046_v44  ;;  %v1417_v50 = vld [vmem:[#allocation8 + $0x4] sm:$0x3]  ;;  %v1425_v3 = vld [vmem:[#allocation8 + $0x6] sm:$0x3] }
 0x13b   :  { %v1151_v61 = vpop.eup %1150  ;;  %622 = vst [vmem:[#allocation7 + $0x6] sm:$0x3] %v1149_v58  ;;  %1170 = vpow2.f32 %v1047_v47 }
 0x13c   :  { %v1153_v0 = vpop.eup %1152  ;;  %739 = vst [vmem:[#allocation9] sm:$0x3] %v1151_v61  ;;  %1172 = vpow2.f32 %v1048_v51  ;;  %v749_v61 = vld [vmem:[#allocation4] sm:$0x3] }
 0x13d   :  { %v1155_v4 = vpop.eup %1154  ;;  %740 = vst [vmem:[#allocation9 + $0x2] sm:$0x3] %v1153_v0  ;;  %1174 = vpow2.f32 %v611_v56  ;;  %vm767_vm0 = vcmp.gt.f32.partialorder %v749_v61, 0.2 }
 0x13e   :  { %v1157_v6 = vpop.eup %1156  ;;  %741 = vst [vmem:[#allocation9 + $0x4] sm:$0x3] %v1155_v4  ;;  %1176 = vpow2.f32 %v613_v59 }
 0x13f   :  { %v1159_v8 = vpop.eup %1158  ;;  %742 = vst [vmem:[#allocation9 + $0x6] sm:$0x3] %v1157_v6  ;;  %1178 = vpow2.f32 %v615_v62  ;;  %v750_v11 = vld [vmem:[#allocation7] sm:$0x3] }
 0x140   :  { %v1161_v12 = vpop.eup %1160  ;;  %571 = vst [vmem:[#allocation6] sm:$0x3] %v1159_v8  ;;  %1180 = vpow2.f32 %v617_v2  ;;  %v754_v26 = vmul.f32 %v1399_v17, %v750_v11  ;;  %v1403_v21 = vmul.f32 %v750_v11, %v1397_v9  ;;  %v779_v29 = vld [vmem:[#allocation7 + $0x2] sm:$0x3] }
 0x141   :  { %v1163_v14 = vpop.eup %1162  ;;  %572 = vst [vmem:[#allocation6 + $0x2] sm:$0x3] %v1161_v12  ;;  %1182 = vpow2.f32 %v731_v5  ;;  %v785_v39 = vmul.f32 %v1407_v35, %v779_v29  ;;  %v809_v43 = vld [vmem:[#allocation7 + $0x4] sm:$0x3]  ;;  %v1415_v48 = vmul.f32 %v779_v29, %v1397_v9 }
 0x142   :  { %v1165_v18 = vpop.eup %1164  ;;  %573 = vst [vmem:[#allocation6 + $0x4] sm:$0x3] %v1163_v14  ;;  %1184 = vpow2.f32 %v733_v7  ;;  %v815_v54 = vmul.f32 %v1417_v50, %v809_v43  ;;  %v839_v59 = vld [vmem:[#allocation7 + $0x6] sm:$0x3]  ;;  %v814_v0 = vmul.f32 %v809_v43, %v1397_v9 }
 0x143   :  { %v1167_v19 = vpop.eup %1166  ;;  %574 = vst [vmem:[#allocation6 + $0x6] sm:$0x3] %v1165_v18  ;;  %1186 = vpow2.f32 %v735_v10  ;;  %v752_v20 = vld [vmem:[#allocation9] sm:$0x3]  ;;  %v845_v6 = vmul.f32 %v1425_v3, %v839_v59  ;;  %v759_v10 = vmul.f32 %v1403_v21, %v1399_v17 }
 0x144   :  { %v1169_v22 = vpop.eup %1168  ;;  %v551_v23 = vadd.f32 1.0, %v1167_v19  ;;  %1188 = vpow2.f32 %v737_v13  ;;  %v755_v24 = vmul.f32 %v752_v20, %v747_v15  ;;  %v757_v25 = vmul.f32 %v752_v20, %v748_v16  ;;  %v783_v36 = vld [vmem:[#allocation9 + $0x2] sm:$0x3]  ;;  %v1436_v20 = vld [vmem:[#allocation8 + $0x8] sm:$0x3] }
 0x145   :  { %v1171_v27 = vpop.eup %1170  ;;  %v552_v28 = vadd.f32 1.0, %v1169_v22  ;;  %v813_v51 = vld [vmem:[#allocation9 + $0x4] sm:$0x3] }
 0x146   :  { %v1173_v30 = vpop.eup %1172  ;;  %v553_v31 = vadd.f32 1.0, %v1171_v27  ;;  %1190 = vrcp.f32 %v551_v23  ;;  %v1405_v52 = vadd.f32 %v755_v24, %v754_v26  ;;  %v758_v32 = vadd.f32 %v757_v25, %v750_v11  ;;  %v843_v4 = vld [vmem:[#allocation9 + $0x6] sm:$0x3] }
 0x147   :  { %v1175_v33 = vpop.eup %1174  ;;  %v554_v34 = vadd.f32 1.0, %v1173_v30  ;;  %1192 = vrcp.f32 %v552_v28  ;;  %v1434_v26 = vmul.f32 %v839_v59, %v1397_v9  ;;  %v770_v30 = vmul.f32 0.3, %v749_v61 }
 0x148   :  { %v1177_v37 = vpop.eup %1176  ;;  %1194 = vrcp.f32 %v553_v31  ;;  %623 = vst [vmem:[#allocation7 + $0x8] sm:$0x3] %v1175_v33  ;;  %v761_v38 = vadd.f32 %v758_v32, %v1403_v21  ;;  %v786_v40 = vmul.f32 %v783_v36, %v1405_v52  ;;  %v788_v42 = vmul.f32 %v783_v36, %v758_v32 }
 0x149   :  { %v1179_v41 = vpop.eup %1178  ;;  %1196 = vrcp.f32 %v554_v34  ;;  %624 = vst [vmem:[#allocation7 + $0xa] sm:$0x3] %v1177_v37  ;;  %v760_v23 = vadd.f32 %v759_v10, %v1405_v52  ;;  %v1449_v37 = vld [vmem:[#allocation8 + $0xa] sm:$0x3] }
 0x14a   :  { %v1181_v44 = vpop.eup %1180  ;;  %625 = vst [vmem:[#allocation7 + $0xc] sm:$0x3] %v1179_v41  ;;  %v762_v45 = vadd.f32 1e-06, %v761_v38  ;;  %v1412_v46 = vadd.f32 %v786_v40, %v785_v39  ;;  %v789_v49 = vadd.f32 %v788_v42, %v779_v29  ;;  %v1065_v29 = vsel %vm767_vm0, 1.0, %v1293_v1 }
 0x14b   :  { %v1183_v47 = vpop.eup %1182  ;;  %626 = vst [vmem:[#allocation7 + $0xe] sm:$0x3] %v1181_v44  ;;  %v765_v38 = vld [vmem:[#allocation6] sm:$0x3]  ;;  %v790_v39 = vmul.f32 %v1415_v48, %v1407_v35 }
 0x14c   :  { %v1185_v53 = vpop.eup %1184  ;;  %743 = vst [vmem:[#allocation9 + $0x8] sm:$0x3] %v1183_v47  ;;  %1198 = vrcp.f32 %v762_v45  ;;  %v816_v55 = vmul.f32 %v813_v51, %v1412_v46  ;;  %v792_v57 = vadd.f32 %v789_v49, %v1415_v48  ;;  %v818_v58 = vmul.f32 %v813_v51, %v789_v49 }
 0x14d   :  { %v1187_v56 = vpop.eup %1186  ;;  %744 = vst [vmem:[#allocation9 + $0xa] sm:$0x3] %v1185_v53  ;;  %v791_v49 = vadd.f32 %v790_v39, %v1412_v46 }
 0x14e   :  { %v1189_v60 = vpop.eup %1188  ;;  %745 = vst [vmem:[#allocation9 + $0xc] sm:$0x3] %v1187_v56  ;;  %v1422_v62 = vadd.f32 %v816_v55, %v815_v54  ;;  %v793_v63 = vadd.f32 1e-06, %v792_v57  ;;  %v819_v2 = vadd.f32 %v818_v58, %v809_v43  ;;  %v772_v43 = vmul.f32 0.2, %v1065_v29 }
 0x14f   :  { %746 = vst [vmem:[#allocation9 + $0xe] sm:$0x3] %v1189_v60  ;;  %v869_v13 = vld [vmem:[#allocation7 + $0x8] sm:$0x3]  ;;  %v820_v55 = vmul.f32 %v814_v0, %v1417_v50  ;;  %v1463_v56 = vld [vmem:[#allocation8 + $0xc] sm:$0x3] }
 0x150   :  { %v1191_v5 = vpop.eup %1190  ;;  %v846_v7 = vmul.f32 %v843_v4, %v1422_v62  ;;  %1200 = vrcp.f32 %v793_v63  ;;  %v822_v11 = vadd.f32 %v819_v2, %v814_v0  ;;  %v848_v12 = vmul.f32 %v843_v4, %v819_v2  ;;  %v899_v27 = vld [vmem:[#allocation7 + $0xa] sm:$0x3]  ;;  %v797_v4 = vld [vmem:[#allocation6 + $0x2] sm:$0x3] }
 0x151   :  { %v1193_v8 = vpop.eup %1192  ;;  %575 = vst [vmem:[#allocation6 + $0x8] sm:$0x3] %v1191_v5  ;;  %v875_v17 = vmul.f32 %v1436_v20, %v869_v13  ;;  %v1447_v34 = vmul.f32 %v869_v13, %v1397_v9  ;;  %v905_v40 = vmul.f32 %v1449_v37, %v899_v27  ;;  %v929_v47 = vld [vmem:[#allocation7 + $0xc] sm:$0x3]  ;;  %v1461_v35 = vmul.f32 %v899_v27, %v1397_v9 }
 0x152   :  { %v1195_v14 = vpop.eup %1194  ;;  %576 = vst [vmem:[#allocation6 + $0xa] sm:$0x3] %v1193_v8  ;;  %v1431_v15 = vadd.f32 %v846_v7, %v845_v6  ;;  %v823_v18 = vadd.f32 1e-06, %v822_v11  ;;  %v849_v19 = vadd.f32 %v848_v12, %v839_v59  ;;  %v935_v60 = vmul.f32 %v1463_v56, %v929_v47  ;;  %v959_v2 = vld [vmem:[#allocation7 + $0xe] sm:$0x3] }
 0x153   :  { %v1197_v16 = vpop.eup %1196  ;;  %577 = vst [vmem:[#allocation6 + $0xc] sm:$0x3] %v1195_v14  ;;  %v873_v22 = vld [vmem:[#allocation9 + $0x8] sm:$0x3]  ;;  %v821_v5 = vadd.f32 %v820_v55, %v1422_v62  ;;  %v1471_v6 = vld [vmem:[#allocation8 + $0xe] sm:$0x3] }
 0x154   :  { %578 = vst [vmem:[#allocation6 + $0xe] sm:$0x3] %v1197_v16  ;;  %v876_v21 = vmul.f32 %v873_v22, %v1431_v15  ;;  %1202 = vrcp.f32 %v823_v18  ;;  %v852_v24 = vadd.f32 %v849_v19, %v1434_v26  ;;  %v878_v25 = vmul.f32 %v873_v22, %v849_v19  ;;  %v903_v52 = vld [vmem:[#allocation9 + $0xa] sm:$0x3] }
 0x155   :  { %v933_v57 = vld [vmem:[#allocation9 + $0xc] sm:$0x3]  ;;  %v965_v14 = vmul.f32 %v1471_v6, %v959_v2 }
 0x156   :  { %v1199_v28 = vpop.eup %1198  ;;  %v1444_v31 = vadd.f32 %v876_v21, %v875_v17  ;;  %v853_v33 = vadd.f32 1e-06, %v852_v24  ;;  %v879_v36 = vadd.f32 %v878_v25, %v869_v13  ;;  %v963_v12 = vld [vmem:[#allocation9 + $0xe] sm:$0x3]  ;;  %v934_v17 = vmul.f32 %v929_v47, %v1397_v9 }
 0x157   :  { %v764_v32 = vmul.f32 %v1199_v28, %v760_v23  ;;  %v850_v25 = vmul.f32 %v1434_v26, %v1425_v3  ;;  %v827_v28 = vld [vmem:[#allocation6 + $0x4] sm:$0x3]  ;;  %v964_v26 = vmul.f32 %v959_v2, %v1397_v9 }
 0x158   :  { %v906_v41 = vmul.f32 %v903_v52, %v1444_v31  ;;  %v882_v44 = vadd.f32 %v879_v36, %v1447_v34  ;;  %v908_v45 = vmul.f32 %v903_v52, %v879_v36  ;;  %1204 = vrcp.f32 %v853_v33 }
 0x159   :  { %v766_v42 = vmul.f32 %v765_v38, %v764_v32  ;;  %v851_v36 = vadd.f32 %v850_v25, %v1431_v15 }
 0x15a   :  { %v1457_v51 = vadd.f32 %v906_v41, %v905_v40  ;;  %v1201_v53 = vpop.eup %1200  ;;  %v909_v48 = vadd.f32 %v908_v45, %v899_v27  ;;  %v883_v59 = vadd.f32 1e-06, %v882_v44  ;;  %v857_v44 = vld [vmem:[#allocation6 + $0x6] sm:$0x3] }
 0x15b   :  { %v771_v54 = vadd.f32 %v770_v30, %v766_v42  ;;  %v795_v58 = vmul.f32 %v1201_v53, %v791_v49  ;;  %v880_v42 = vmul.f32 %v1447_v34, %v1436_v20  ;;  %v910_v20 = vmul.f32 %v1461_v35, %v1449_v37  ;;  %v977_v25 = vld [vmem:[#allocation6 + $0xe] sm:$0x3] }
 0x15c   :  { %v936_v46 = vmul.f32 %v933_v57, %v1457_v51  ;;  %v938_v63 = vmul.f32 %v933_v57, %v909_v48  ;;  %v912_v50 = vadd.f32 %v909_v48, %v1461_v35  ;;  %1206 = vrcp.f32 %v883_v59 }
 0x15d   :  { %v773_v61 = vsub.f32 %v771_v54, %v772_v43  ;;  %v798_v8 = vmul.f32 %v797_v4, %v795_v58  ;;  %v881_v49 = vadd.f32 %v880_v42, %v1444_v31  ;;  %v887_v58 = vld [vmem:[#allocation6 + $0x8] sm:$0x3] }
 0x15e   :  { %v1469_v0 = vadd.f32 %v936_v46, %v935_v60  ;;  %v1203_v7 = vpop.eup %1202  ;;  %v939_v11 = vadd.f32 %v938_v63, %v929_v47  ;;  %v913_v22 = vadd.f32 1e-06, %v912_v50  ;;  %v911_v46 = vadd.f32 %v910_v20, %v1457_v51 }
 0x15f   :  { %vm774_vm1 = vcmp.gt.f32.partialorder %v773_v61, 0.2  ;;  %v799_v10 = vmul.f32 0.3, %v773_v61  ;;  %v825_v19 = vmul.f32 %v1203_v7, %v821_v5  ;;  %v940_v5 = vmul.f32 %v934_v17, %v1463_v56  ;;  %v917_v7 = vld [vmem:[#allocation6 + $0xa] sm:$0x3] }
 0x160   :  { %v1066_v13 = vsel %vm774_vm1, 1.0, %v1293_v1  ;;  %v966_v16 = vmul.f32 %v963_v12, %v1469_v0  ;;  %v968_v23 = vmul.f32 %v963_v12, %v939_v11  ;;  %v942_v29 = vadd.f32 %v939_v11, %v934_v17 }
 0x161   :  { %777 = vst [vmem:[#allocation15] sm:$0x3] %v1066_v13  ;;  %v800_v62 = vadd.f32 %v799_v10, %v798_v8  ;;  %v801_v18 = vmul.f32 0.2, %v1066_v13  ;;  %v828_v32 = vmul.f32 %v827_v28, %v825_v19  ;;  %1208 = vrcp.f32 %v913_v22 }
 0x162   :  { %v1477_v21 = vadd.f32 %v966_v16, %v965_v14  ;;  %v1205_v27 = vpop.eup %1204  ;;  %v969_v30 = vadd.f32 %v968_v23, %v959_v2  ;;  %v943_v3 = vadd.f32 1e-06, %v942_v29  ;;  %v941_v8 = vadd.f32 %v940_v5, %v1469_v0 }
 0x163   :  { %v802_v24 = vsub.f32 %v800_v62, %v801_v18  ;;  %v855_v40 = vmul.f32 %v1205_v27, %v851_v36  ;;  %v970_v14 = vmul.f32 %v964_v26, %v1471_v6  ;;  %v947_v62 = vld [vmem:[#allocation6 + $0xc] sm:$0x3] }
 0x164   :  { %988 = vst [vmem:[#allocation2] sm:$0x3] %v1477_v21  ;;  %989 = vst [vmem:[#allocation3] sm:$0x3] %v969_v30  ;;  %v972_v45 = vadd.f32 %v969_v30, %v964_v26  ;;  %1210 = vrcp.f32 %v943_v3 }
 0x165   :  { %vm803_vm2 = vcmp.gt.f32.partialorder %v802_v24, 0.2  ;;  %v829_v33 = vmul.f32 0.3, %v802_v24  ;;  %v858_v15 = vmul.f32 %v857_v44, %v855_v40  ;;  %v971_v19 = vadd.f32 %v970_v14, %v1477_v21 }
 0x166   :  { %v1067_v52 = vsel %vm803_vm2, 1.0, %v1293_v1  ;;  %v1207_v43 = vpop.eup %1206  ;;  %v973_v9 = vadd.f32 1e-06, %v972_v45 }
 0x167   :  { %807 = vst [vmem:[#allocation15 + $0x2] sm:$0x3] %v1067_v52  ;;  %v830_v38 = vadd.f32 %v829_v33, %v828_v32  ;;  %v831_v39 = vmul.f32 0.2, %v1067_v52  ;;  %v885_v48 = vmul.f32 %v1207_v43, %v881_v49 }
 0x168   :  { %1212 = vrcp.f32 %v973_v9 }
 0x169   :  { %v832_v41 = vsub.f32 %v830_v38, %v831_v39  ;;  %v888_v59 = vmul.f32 %v887_v58, %v885_v48 }
 0x16b   :  { %vm833_vm3 = vcmp.gt.f32.partialorder %v832_v41, 0.2  ;;  %v859_v47 = vmul.f32 0.3, %v832_v41  ;;  %v1209_v34 = vpop.eup %1208 }
 0x16c   :  { %v1068_v53 = vsel %vm833_vm3, 1.0, %v1293_v1  ;;  %v915_v2 = vmul.f32 %v1209_v34, %v911_v46 }
 0x16d   :  { %837 = vst [vmem:[#allocation15 + $0x4] sm:$0x3] %v1068_v53  ;;  %v860_v54 = vadd.f32 %v859_v47, %v858_v15  ;;  %v861_v55 = vmul.f32 0.2, %v1068_v53 }
 0x16e   :  { %v1211_v50 = vpop.eup %1210  ;;  %v918_v37 = vmul.f32 %v917_v7, %v915_v2 }
 0x16f   :  { %v862_v57 = vsub.f32 %v860_v54, %v861_v55  ;;  %v945_v12 = vmul.f32 %v1211_v50, %v941_v8 }
 0x171   :  { %vm863_vm4 = vcmp.gt.f32.partialorder %v862_v57, 0.2  ;;  %v889_v60 = vmul.f32 0.3, %v862_v57  ;;  %v948_v56 = vmul.f32 %v947_v62, %v945_v12 }
 0x172   :  { %v1069_v31 = vsel %vm863_vm4, 1.0, %v1293_v1  ;;  %v1213_v16 = vpop.eup %1212 }
 0x173   :  { %867 = vst [vmem:[#allocation15 + $0x6] sm:$0x3] %v1069_v31  ;;  %v890_v61 = vadd.f32 %v889_v60, %v888_v59  ;;  %v891_v63 = vmul.f32 0.2, %v1069_v31  ;;  %v975_v23 = vmul.f32 %v1213_v16, %v971_v19 }
 0x175   :  { %v892_v4 = vsub.f32 %v890_v61, %v891_v63  ;;  %v978_v27 = vmul.f32 %v977_v25, %v975_v23 }
 0x177   :  { %vm893_vm5 = vcmp.gt.f32.partialorder %v892_v4, 0.2  ;;  %v919_v35 = vmul.f32 0.3, %v892_v4 }
 0x178   :  { %v1070_v10 = vsel %vm893_vm5, 1.0, %v1293_v1 }
 0x179   :  { %897 = vst [vmem:[#allocation15 + $0x8] sm:$0x3] %v1070_v10  ;;  %v920_v51 = vadd.f32 %v919_v35, %v918_v37  ;;  %v921_v11 = vmul.f32 0.2, %v1070_v10 }
 0x17b   :  { %v922_v13 = vsub.f32 %v920_v51, %v921_v11 }
 0x17d   :  { %vm923_vm6 = vcmp.gt.f32.partialorder %v922_v13, 0.2  ;;  %v949_v18 = vmul.f32 0.3, %v922_v13 }
 0x17e   :  { %v1071_v22 = vsel %vm923_vm6, 1.0, %v1293_v1 }
 0x17f   :  { %927 = vst [vmem:[#allocation15 + $0xa] sm:$0x3] %v1071_v22  ;;  %v950_v0 = vadd.f32 %v949_v18, %v948_v56  ;;  %v951_v17 = vmul.f32 0.2, %v1071_v22 }
 0x181   :  { %v952_v24 = vsub.f32 %v950_v0, %v951_v17 }
 0x183   :  { %vm953_vm7 = vcmp.gt.f32.partialorder %v952_v24, 0.2  ;;  %v979_v28 = vmul.f32 0.3, %v952_v24 }
 0x184   :  { %v1072_v6 = vsel %vm953_vm7, 1.0, %v1293_v1 }
 0x185   :  { %957 = vst [vmem:[#allocation15 + $0xc] sm:$0x3] %v1072_v6  ;;  %v980_v29 = vadd.f32 %v979_v28, %v978_v27  ;;  %v981_v30 = vmul.f32 0.2, %v1072_v6 }
 0x187   :  { %v982_v32 = vsub.f32 %v980_v29, %v981_v30 }
 0x189   :  { %vm983_vm8 = vcmp.gt.f32.partialorder %v982_v32, 0.2  ;;  %990 = vst [vmem:[#allocation4] sm:$0x3] %v982_v32 }
 0x18a   :  { %v1073_v21 = vsel %vm983_vm8, 1.0, %v1293_v1 }
 0x18b   :  { %987 = vst [vmem:[#allocation15 + $0xe] sm:$0x3] %v1073_v21 }
 0x18c   :  { %1269 = shalt.err (!%p1266_p6)
}
 0x18d   :  { %s1270_s22 = scalar_lea.hbm %s1520_s4, 256 }
 0x18e   :  { %p1271_p7 = scmp.ne.s32.totalorder %s1520_s4, %s1270_s22  ;;  %p1274_p8 = scmp.lt.u32.totalorder %s1270_s22, %s1520_s4 }
 0x190   :  { %p1276_p9 = pnand %p1274_p8, %p1271_p7 }
 0x192   :  { %1279 = shalt.err (!%p1276_p9)
}
 0x193   :  { %1002 = dma.vmem_to_hbm [thread:$0]  %s997_s18, 256, %s1520_s4, [#allocation12], %s1287_s25, %s1287_s25, %s1288_s26  }
 0x194   :  { %1284 = dma.done.wait [#allocation12], 256  }
 0x195   :  { %1285 = vsyncadd [#allocation12], 4294967040 }
 0x196   :  { %1006 = vsyncpa [#allocation11], 1 }
 0x197   :  { %1007 = vsyncpa [#allocation14], 1 }
 0x198   :  { %1008 = vsyncpa [#allocation12], 1 }

</bundles_post_ra>
